<compile_context>
chip_gen: v5e
topology: v5e:2x2
jax: 0.10.0
libtpu: 0.0.40
codegen_flags: <defaults>
</compile_context>

<pallas_src>
import jax
import jax.numpy as jnp
from jax.experimental import pallas as pl
from jax.experimental.pallas import tpu as pltpu


def _round_up(x, m):
    return (x + m - 1) // m * m


def _layer_norm_1pass(x, gamma, beta, eps=1e-12):
    # One reduction pass: biased var = E[x^2] - mu^2 (clamped for fp safety).
    mu = jnp.mean(x, axis=-1, keepdims=True)
    var = jnp.mean(x * x, axis=-1, keepdims=True) - mu * mu
    var = jnp.maximum(var, 0.0)
    return (x - mu) * jax.lax.rsqrt(var + eps) * gamma + beta


def _visual_feat_encoder_kernel(feats_ref, boxes_ref, vw_ref, bw_ref, pvec_ref, out_ref):
    # Packed per-channel vectors (f32), one DMA:
    #   row 0: visn_fc bias, 1: visn LN gamma, 2: visn LN beta,
    #   row 3: box_fc bias,  4: box LN gamma,  5: box LN beta   (rows 6,7: pad)
    vb = pvec_ref[0:1, :]
    vg = pvec_ref[1:2, :]
    vbe = pvec_ref[2:3, :]
    bb = pvec_ref[3:4, :]
    bg = pvec_ref[4:5, :]
    bbe = pvec_ref[5:6, :]

    # --- visn branch: in-kernel bf16 cast (VPU, hidden under MXU), f32 accum ---
    f = feats_ref[...].astype(vw_ref.dtype)
    x = jnp.dot(f, vw_ref[...], preferred_element_type=jnp.float32) + vb
    x = _layer_norm_1pass(x, vg, vbe)

    # --- box branch: pos_dim padded to 8 in the wrapper -> small K-aligned MXU
    # matmul (keeps the VALU slot free; the MXU has slack here) ---
    y = jnp.dot(boxes_ref[...], bw_ref[...], preferred_element_type=jnp.float32) + bb
    y = _layer_norm_1pass(y, bg, bbe)

    # average (dropout is identity at inference); lane-dense bf16 store
    out_ref[...] = ((x + y) * 0.5).astype(out_ref.dtype)


def visual_feat_encoder(feats, boxes, params, *, row_tile=512,
                        compute_dtype=jnp.bfloat16, out_dtype=jnp.bfloat16):
    """feats: (B, N, feat_dim), boxes: (B, N, pos_dim) -> (B, N, hidden)."""
    B, N, feat_dim = feats.shape
    _, _, pos_dim = boxes.shape
    hidden = params["visn_w"].shape[1]
    rows = B * N

    assert row_tile % 16 == 0, "row_tile must be a multiple of 16 (bf16 sublane packing)"
    # Largest 16-multiple tile <= rows (last block is the only partial one).
    rt = min(row_tile, max(16, (rows // 16) * 16))
    n_tiles = pl.cdiv(rows, rt)
    # Megacore balance (v7x has 2 TensorCores sharding the "parallel" axis):
    # prefer an even tile count as long as tiles stay reasonably large.
    if n_tiles > 1 and n_tiles % 2 == 1:
        rt_even = _round_up(pl.cdiv(rows, n_tiles + 1), 16)
        if rt_even >= 128:
            rt = rt_even
            n_tiles = pl.cdiv(rows, rt)

    # feats: no astype / pad / slice passes (contiguous reshape is free).
    f2 = feats.reshape(rows, feat_dim)
    # boxes are tiny (pos_dim = 4/5): pad K to 8 once so the box matmul is an
    # aligned MXU op instead of per-column VPU broadcast-FMAs.
    pos_pad = _round_up(max(pos_dim, 8), 8)
    b2 = jnp.pad(boxes.reshape(rows, pos_dim).astype(jnp.float32),
                 ((0, 0), (0, pos_pad - pos_dim)))

    vw = params["visn_w"].astype(compute_dtype)                 # (feat_dim, hidden) bf16
    bw = jnp.pad(params["box_w"].astype(jnp.float32),
                 ((0, pos_pad - pos_dim), (0, 0)))              # (pos_pad, hidden) f32

    # Pack the six per-channel vectors into one (8, hidden) f32 block.
    pvec = jnp.stack(
        [params["visn_b"], params["visn_ln_g"], params["visn_ln_b"],
         params["box_b"], params["box_ln_g"], params["box_ln_b"]],
        axis=0,
    ).astype(jnp.float32)
    pvec = jnp.pad(pvec, ((0, 8 - pvec.shape[0]), (0, 0)))      # (8, hidden)

    def _bytes(shape, dt):
        n = 1
        for s in shape:
            n *= s
        return n * jnp.dtype(dt).itemsize

    # VMEM budget: double-buffered streaming tiles + constant operands (the x2
    # on constants also covers the double-buffered fallback), +50% headroom.
    est = (2 * (_bytes((rt, feat_dim), f2.dtype)
                + _bytes((rt, pos_pad), jnp.float32)
                + _bytes((rt, hidden), out_dtype))
           + 2 * (_bytes((feat_dim, hidden), compute_dtype)
                  + _bytes((pos_pad, hidden), jnp.float32)
                  + _bytes((8, hidden), jnp.float32)))
    try:
        vmem_cap = int(pltpu.get_tpu_info().vmem_capacity_bytes)
    except Exception:
        vmem_cap = 128 * 1024 * 1024
    vmem_limit = max(est + est // 2, 32 * 1024 * 1024)
    vmem_limit = min(vmem_limit, vmem_cap * 3 // 4)
    vmem_limit = max(vmem_limit, est)

    cost = pl.CostEstimate(
        flops=2 * rows * (feat_dim + pos_pad) * hidden + 10 * rows * hidden,
        transcendentals=2 * rows,
        bytes_accessed=(_bytes(f2.shape, f2.dtype) + _bytes(b2.shape, b2.dtype)
                        + _bytes(vw.shape, vw.dtype) + _bytes(bw.shape, bw.dtype)
                        + _bytes(pvec.shape, pvec.dtype)
                        + _bytes((rows, hidden), out_dtype)),
    )

    def _const_spec(shape, pm):
        if pm is None:
            return pl.BlockSpec(shape, lambda i: (0, 0))
        return pl.BlockSpec(shape, lambda i: (0, 0), pipeline_mode=pm)

    def _run(single_buffer_consts):
        pm = pl.Buffered(1) if single_buffer_consts else None
        return pl.pallas_call(
            _visual_feat_encoder_kernel,
            out_shape=jax.ShapeDtypeStruct((rows, hidden), out_dtype),
            grid_spec=pltpu.PrefetchScalarGridSpec(
                num_scalar_prefetch=0,
                grid=(n_tiles,),
                in_specs=[
                    pl.BlockSpec((rt, feat_dim), lambda i: (i, 0)),   # feats tile (native dtype)
                    pl.BlockSpec((rt, pos_pad), lambda i: (i, 0)),    # boxes tile (f32)
                    _const_spec((feat_dim, hidden), pm),              # visn weight (bf16, const)
                    _const_spec((pos_pad, hidden), pm),               # box weight (f32, const)
                    _const_spec((8, hidden), pm),                     # packed vectors (f32, const)
                ],
                out_specs=pl.BlockSpec((rt, hidden), lambda i: (i, 0)),
            ),
            compiler_params=pltpu.CompilerParams(
                dimension_semantics=("parallel",),
                vmem_limit_bytes=int(vmem_limit),
            ),
            cost_estimate=cost,
        )(f2, b2, vw, bw, pvec)

    try:
        out = _run(True)
    except Exception:
        # TODO(synk): pl.Buffered(1) not accepted by this jax version; fall back
        # to the default double-buffered constant operands.
        out = _run(False)

    return out.reshape(B, N, hidden)


def _layer_norm_ref(x, gamma, beta, eps=1e-12):
    mu = jnp.mean(x, axis=-1, keepdims=True)
    var = jnp.mean((x - mu) ** 2, axis=-1, keepdims=True)
    return (x - mu) * jax.lax.rsqrt(var + eps) * gamma + beta


def _reference(feats, boxes, params, compute_dtype=jnp.bfloat16):
    """Pure-JAX reference mirroring the PyTorch forward (bf16 matmul inputs)."""
    B, N, feat_dim = feats.shape
    pos_dim = boxes.shape[-1]
    x = jnp.dot(
        feats.reshape(-1, feat_dim).astype(compute_dtype),
        params["visn_w"].astype(compute_dtype),
        preferred_element_type=jnp.float32,
    ) + params["visn_b"]
    x = _layer_norm_ref(x, params["visn_ln_g"], params["visn_ln_b"])
    y = boxes.reshape(-1, pos_dim).astype(jnp.float32) @ params["box_w"].astype(jnp.float32)
    y = y + params["box_b"]
    y = _layer_norm_ref(y, params["box_ln_g"], params["box_ln_b"])
    return ((x + y) * 0.5).reshape(B, N, -1)


if __name__ == "__main__":
    # Small synthetic shapes consistent with the module (real: feat=2048/4096,
    # pos=4/5, hidden=768). hidden=128 keeps the output lane-dense; N=9 makes
    # rows (=18) not a multiple of the tile so the masked partial-block path
    # is exercised (no wrapper padding / slicing anymore).
    B, N, FEAT_DIM, POS_DIM, HIDDEN = 2, 9, 256, 4, 128

    key = jax.random.PRNGKey(0)
    ks = jax.random.split(key, 10)

    feats = jax.random.normal(ks[0], (B, N, FEAT_DIM), dtype=jnp.float32)
    boxes = jax.random.uniform(ks[1], (B, N, POS_DIM), dtype=jnp.float32)

    params = {
        "visn_w": 0.02 * jax.random.normal(ks[2], (FEAT_DIM, HIDDEN), dtype=jnp.float32),
        "visn_b": 0.01 * jax.random.normal(ks[3], (HIDDEN,), dtype=jnp.float32),
        "visn_ln_g": jnp.ones((HIDDEN,), jnp.float32)
        + 0.05 * jax.random.normal(ks[4], (HIDDEN,), dtype=jnp.float32),
        "visn_ln_b": 0.05 * jax.random.normal(ks[5], (HIDDEN,), dtype=jnp.float32),
        "box_w": 0.02 * jax.random.normal(ks[6], (POS_DIM, HIDDEN), dtype=jnp.float32),
        "box_b": 0.01 * jax.random.normal(ks[7], (HIDDEN,), dtype=jnp.float32),
        "box_ln_g": jnp.ones((HIDDEN,), jnp.float32)
        + 0.05 * jax.random.normal(ks[8], (HIDDEN,), dtype=jnp.float32),
        "box_ln_b": 0.05 * jax.random.normal(ks[9], (HIDDEN,), dtype=jnp.float32),
    }

    out = visual_feat_encoder(feats, boxes, params)
    out = jax.block_until_ready(out)

    ref = _reference(feats, boxes, params)
    assert out.shape == (B, N, HIDDEN)
    # bf16 matmul inputs / bf16 output -> compare at bf16-level tolerance.
    assert jnp.allclose(out.astype(jnp.float32), ref, atol=2e-2, rtol=2e-2), \
        "mismatch vs reference"

    print("KERNEL_OK")
</pallas_src>

<mosaic_0001>
module attributes {stable_mosaic.version = 11 : i64} {
  func.func @_visual_feat_encoder_kernel(%arg0: i32, %arg1: memref<16x256xf32, #tpu.memory_space<vmem>>, %arg2: memref<16x8xf32, #tpu.memory_space<vmem>>, %arg3: memref<256x128xbf16, #tpu.memory_space<vmem>>, %arg4: memref<8x128xf32, #tpu.memory_space<vmem>>, %arg5: memref<8x128xf32, #tpu.memory_space<vmem>>, %arg6: memref<16x128xbf16, #tpu.memory_space<vmem>>) attributes {dimension_semantics = [#tpu.dimension_semantics<parallel>], iteration_bounds = array<i64: 2>, scalar_prefetch = 0 : i64, scratch_operands = 0 : i64, tpu.core_type = #tpu.core_type<tc>, window_params = [{transform_indices = @transform_0, window_bounds = array<i64: 16, 256>}, {transform_indices = @transform_1, window_bounds = array<i64: 16, 8>}, {pipeline_mode = #tpu.pipeline_mode<synchronous>, transform_indices = @transform_2, window_bounds = array<i64: 256, 128>}, {pipeline_mode = #tpu.pipeline_mode<synchronous>, transform_indices = @transform_3, window_bounds = array<i64: 8, 128>}, {pipeline_mode = #tpu.pipeline_mode<synchronous>, transform_indices = @transform_4, window_bounds = array<i64: 8, 128>}, {transform_indices = @transform_5, window_bounds = array<i64: 16, 128>}]} {
    %c0 = arith.constant 0 : index
    %c0_0 = arith.constant 0 : index
    %0 = vector.load %arg5[%c0, %c0_0] : memref<8x128xf32, #tpu.memory_space<vmem>>, vector<1x128xf32>
    %c1 = arith.constant 1 : index
    %c0_1 = arith.constant 0 : index
    %1 = vector.load %arg5[%c1, %c0_1] : memref<8x128xf32, #tpu.memory_space<vmem>>, vector<1x128xf32>
    %c2 = arith.constant 2 : index
    %c0_2 = arith.constant 0 : index
    %2 = vector.load %arg5[%c2, %c0_2] : memref<8x128xf32, #tpu.memory_space<vmem>>, vector<1x128xf32>
    %c3 = arith.constant 3 : index
    %c0_3 = arith.constant 0 : index
    %3 = vector.load %arg5[%c3, %c0_3] : memref<8x128xf32, #tpu.memory_space<vmem>>, vector<1x128xf32>
    %c4 = arith.constant 4 : index
    %c0_4 = arith.constant 0 : index
    %4 = vector.load %arg5[%c4, %c0_4] : memref<8x128xf32, #tpu.memory_space<vmem>>, vector<1x128xf32>
    %c5 = arith.constant 5 : index
    %c0_5 = arith.constant 0 : index
    %5 = vector.load %arg5[%c5, %c0_5] : memref<8x128xf32, #tpu.memory_space<vmem>>, vector<1x128xf32>
    %c0_6 = arith.constant 0 : index
    %c0_7 = arith.constant 0 : index
    %6 = vector.load %arg1[%c0_6, %c0_7] : memref<16x256xf32, #tpu.memory_space<vmem>>, vector<16x256xf32>
    %7 = arith.truncf %6 : vector<16x256xf32> to vector<16x256xbf16>
    %c0_8 = arith.constant 0 : index
    %c0_9 = arith.constant 0 : index
    %8 = vector.load %arg3[%c0_8, %c0_9] : memref<256x128xbf16, #tpu.memory_space<vmem>>, vector<256x128xbf16>
    %cst = arith.constant dense<0.000000e+00> : vector<16x128xf32>
    %9 = tpu.matmul %7, %8, %cst {dimension_numbers = #tpu.dot_dimension_numbers<[1], [0], [0], [1], [0, 0, 1, 1], [], []>} : vector<16x256xbf16>, vector<256x128xbf16>, vector<16x128xf32> -> vector<16x128xf32>
    %10 = vector.broadcast %0 : vector<1x128xf32> to vector<16x128xf32>
    %11 = arith.addf %9, %10 : vector<16x128xf32>
    %cst_10 = arith.constant dense<0.000000e+00> : vector<16xf32>
    %12 = vector.multi_reduction <add>, %11, %cst_10 [1] : vector<16x128xf32> to vector<16xf32>
    %13 = vector.shape_cast %12 : vector<16xf32> to vector<16x1xf32>
    %cst_11 = arith.constant 1.280000e+02 : f32
    %14 = vector.broadcast %cst_11 : f32 to vector<16x1xf32>
    %15 = arith.divf %13, %14 : vector<16x1xf32>
    %16 = arith.mulf %11, %11 : vector<16x128xf32>
    %cst_12 = arith.constant dense<0.000000e+00> : vector<16xf32>
    %17 = vector.multi_reduction <add>, %16, %cst_12 [1] : vector<16x128xf32> to vector<16xf32>
    %18 = vector.shape_cast %17 : vector<16xf32> to vector<16x1xf32>
    %cst_13 = arith.constant 1.280000e+02 : f32
    %19 = vector.broadcast %cst_13 : f32 to vector<16x1xf32>
    %20 = arith.divf %18, %19 : vector<16x1xf32>
    %21 = arith.mulf %15, %15 : vector<16x1xf32>
    %22 = arith.subf %20, %21 : vector<16x1xf32>
    %cst_14 = arith.constant 0.000000e+00 : f32
    %23 = vector.broadcast %cst_14 : f32 to vector<16x1xf32>
    %24 = arith.maximumf %22, %23 : vector<16x1xf32>
    %25 = vector.broadcast %15 : vector<16x1xf32> to vector<16x128xf32>
    %26 = arith.subf %11, %25 : vector<16x128xf32>
    %cst_15 = arith.constant 9.99999996E-13 : f32
    %27 = vector.broadcast %cst_15 : f32 to vector<16x1xf32>
    %28 = arith.addf %24, %27 : vector<16x1xf32>
    %29 = math.rsqrt %28 : vector<16x1xf32>
    %30 = vector.broadcast %29 : vector<16x1xf32> to vector<16x128xf32>
    %31 = arith.mulf %26, %30 : vector<16x128xf32>
    %32 = vector.broadcast %1 : vector<1x128xf32> to vector<16x128xf32>
    %33 = arith.mulf %31, %32 : vector<16x128xf32>
    %34 = vector.broadcast %2 : vector<1x128xf32> to vector<16x128xf32>
    %35 = arith.addf %33, %34 : vector<16x128xf32>
    %c0_16 = arith.constant 0 : index
    %c0_17 = arith.constant 0 : index
    %36 = vector.load %arg2[%c0_16, %c0_17] : memref<16x8xf32, #tpu.memory_space<vmem>>, vector<16x8xf32>
    %c0_18 = arith.constant 0 : index
    %c0_19 = arith.constant 0 : index
    %37 = vector.load %arg4[%c0_18, %c0_19] : memref<8x128xf32, #tpu.memory_space<vmem>>, vector<8x128xf32>
    %cst_20 = arith.constant dense<0.000000e+00> : vector<16x128xf32>
    %38 = tpu.matmul %36, %37, %cst_20 {dimension_numbers = #tpu.dot_dimension_numbers<[1], [0], [0], [1], [0, 0, 1, 1], [], []>} : vector<16x8xf32>, vector<8x128xf32>, vector<16x128xf32> -> vector<16x128xf32>
    %39 = vector.broadcast %3 : vector<1x128xf32> to vector<16x128xf32>
    %40 = arith.addf %38, %39 : vector<16x128xf32>
    %cst_21 = arith.constant dense<0.000000e+00> : vector<16xf32>
    %41 = vector.multi_reduction <add>, %40, %cst_21 [1] : vector<16x128xf32> to vector<16xf32>
    %42 = vector.shape_cast %41 : vector<16xf32> to vector<16x1xf32>
    %cst_22 = arith.constant 1.280000e+02 : f32
    %43 = vector.broadcast %cst_22 : f32 to vector<16x1xf32>
    %44 = arith.divf %42, %43 : vector<16x1xf32>
    %45 = arith.mulf %40, %40 : vector<16x128xf32>
    %cst_23 = arith.constant dense<0.000000e+00> : vector<16xf32>
    %46 = vector.multi_reduction <add>, %45, %cst_23 [1] : vector<16x128xf32> to vector<16xf32>
    %47 = vector.shape_cast %46 : vector<16xf32> to vector<16x1xf32>
    %cst_24 = arith.constant 1.280000e+02 : f32
    %48 = vector.broadcast %cst_24 : f32 to vector<16x1xf32>
    %49 = arith.divf %47, %48 : vector<16x1xf32>
    %50 = arith.mulf %44, %44 : vector<16x1xf32>
    %51 = arith.subf %49, %50 : vector<16x1xf32>
    %cst_25 = arith.constant 0.000000e+00 : f32
    %52 = vector.broadcast %cst_25 : f32 to vector<16x1xf32>
    %53 = arith.maximumf %51, %52 : vector<16x1xf32>
    %54 = vector.broadcast %44 : vector<16x1xf32> to vector<16x128xf32>
    %55 = arith.subf %40, %54 : vector<16x128xf32>
    %cst_26 = arith.constant 9.99999996E-13 : f32
    %56 = vector.broadcast %cst_26 : f32 to vector<16x1xf32>
    %57 = arith.addf %53, %56 : vector<16x1xf32>
    %58 = math.rsqrt %57 : vector<16x1xf32>
    %59 = vector.broadcast %58 : vector<16x1xf32> to vector<16x128xf32>
    %60 = arith.mulf %55, %59 : vector<16x128xf32>
    %61 = vector.broadcast %4 : vector<1x128xf32> to vector<16x128xf32>
    %62 = arith.mulf %60, %61 : vector<16x128xf32>
    %63 = vector.broadcast %5 : vector<1x128xf32> to vector<16x128xf32>
    %64 = arith.addf %62, %63 : vector<16x128xf32>
    %65 = arith.addf %35, %64 : vector<16x128xf32>
    %cst_27 = arith.constant 5.000000e-01 : f32
    %66 = vector.broadcast %cst_27 : f32 to vector<16x128xf32>
    %67 = arith.mulf %65, %66 : vector<16x128xf32>
    %68 = arith.truncf %67 : vector<16x128xf32> to vector<16x128xbf16>
    %c0_28 = arith.constant 0 : index
    %c0_29 = arith.constant 0 : index
    %69 = vector.load %arg6[%c0_28, %c0_29] : memref<16x128xbf16, #tpu.memory_space<vmem>>, vector<16x128xbf16>
    tpu.vector_store %arg6[%c0_28, %c0_29], %68 {strides = array<i32>} : memref<16x128xbf16, #tpu.memory_space<vmem>>, vector<16x128xbf16>,
    return
  }
  func.func @transform_0(%arg0: i32) -> (i32, i32) {
    %c0_i32 = arith.constant 0 : i32
    %c0_i32_0 = arith.constant 0 : i32
    return %arg0, %c0_i32 : i32, i32
  }
  func.func @transform_1(%arg0: i32) -> (i32, i32) {
    %c0_i32 = arith.constant 0 : i32
    %c0_i32_0 = arith.constant 0 : i32
    return %arg0, %c0_i32 : i32, i32
  }
  func.func @transform_2(%arg0: i32) -> (i32, i32) {
    %c0_i32 = arith.constant 0 : i32
    %c0_i32_0 = arith.constant 0 : i32
    %c0_i32_1 = arith.constant 0 : i32
    return %c0_i32, %c0_i32_0 : i32, i32
  }
  func.func @transform_3(%arg0: i32) -> (i32, i32) {
    %c0_i32 = arith.constant 0 : i32
    %c0_i32_0 = arith.constant 0 : i32
    %c0_i32_1 = arith.constant 0 : i32
    return %c0_i32, %c0_i32_0 : i32, i32
  }
  func.func @transform_4(%arg0: i32) -> (i32, i32) {
    %c0_i32 = arith.constant 0 : i32
    %c0_i32_0 = arith.constant 0 : i32
    %c0_i32_1 = arith.constant 0 : i32
    return %c0_i32, %c0_i32_0 : i32, i32
  }
  func.func @transform_5(%arg0: i32) -> (i32, i32) {
    %c0_i32 = arith.constant 0 : i32
    %c0_i32_0 = arith.constant 0 : i32
    return %arg0, %c0_i32 : i32, i32
  }
}

module attributes {stable_mosaic.version = 11 : i64} {
  func.func @_visual_feat_encoder_kernel(%arg0: i32, %arg1: memref<16x256xf32, #tpu.memory_space<vmem>>, %arg2: memref<16x8xf32, #tpu.memory_space<vmem>>, %arg3: memref<256x128xbf16, #tpu.memory_space<vmem>>, %arg4: memref<8x128xf32, #tpu.memory_space<vmem>>, %arg5: memref<8x128xf32, #tpu.memory_space<vmem>>, %arg6: memref<16x128xbf16, #tpu.memory_space<vmem>>) attributes {dimension_semantics = [#tpu.dimension_semantics<parallel>], iteration_bounds = array<i64: 2>, scalar_prefetch = 0 : i64, scratch_operands = 0 : i64, tpu.core_type = #tpu.core_type<tc>, window_params = [{transform_indices = @transform_0, window_bounds = array<i64: 16, 256>}, {transform_indices = @transform_1, window_bounds = array<i64: 16, 8>}, {pipeline_mode = #tpu.pipeline_mode<synchronous>, transform_indices = @transform_2, window_bounds = array<i64: 256, 128>}, {pipeline_mode = #tpu.pipeline_mode<synchronous>, transform_indices = @transform_3, window_bounds = array<i64: 8, 128>}, {pipeline_mode = #tpu.pipeline_mode<synchronous>, transform_indices = @transform_4, window_bounds = array<i64: 8, 128>}, {transform_indices = @transform_5, window_bounds = array<i64: 16, 128>}]} {
    %c0 = arith.constant 0 : index
    %c0_0 = arith.constant 0 : index
    %0 = vector.load %arg5[%c0, %c0_0] : memref<8x128xf32, #tpu.memory_space<vmem>>, vector<1x128xf32>
    %c1 = arith.constant 1 : index
    %c0_1 = arith.constant 0 : index
    %1 = vector.load %arg5[%c1, %c0_1] : memref<8x128xf32, #tpu.memory_space<vmem>>, vector<1x128xf32>
    %c2 = arith.constant 2 : index
    %c0_2 = arith.constant 0 : index
    %2 = vector.load %arg5[%c2, %c0_2] : memref<8x128xf32, #tpu.memory_space<vmem>>, vector<1x128xf32>
    %c3 = arith.constant 3 : index
    %c0_3 = arith.constant 0 : index
    %3 = vector.load %arg5[%c3, %c0_3] : memref<8x128xf32, #tpu.memory_space<vmem>>, vector<1x128xf32>
    %c4 = arith.constant 4 : index
    %c0_4 = arith.constant 0 : index
    %4 = vector.load %arg5[%c4, %c0_4] : memref<8x128xf32, #tpu.memory_space<vmem>>, vector<1x128xf32>
    %c5 = arith.constant 5 : index
    %c0_5 = arith.constant 0 : index
    %5 = vector.load %arg5[%c5, %c0_5] : memref<8x128xf32, #tpu.memory_space<vmem>>, vector<1x128xf32>
    %c0_6 = arith.constant 0 : index
    %c0_7 = arith.constant 0 : index
    %6 = vector.load %arg1[%c0_6, %c0_7] : memref<16x256xf32, #tpu.memory_space<vmem>>, vector<16x256xf32>
    %7 = arith.truncf %6 : vector<16x256xf32> to vector<16x256xbf16>
    %c0_8 = arith.constant 0 : index
    %c0_9 = arith.constant 0 : index
    %8 = vector.load %arg3[%c0_8, %c0_9] : memref<256x128xbf16, #tpu.memory_space<vmem>>, vector<256x128xbf16>
    %cst = arith.constant dense<0.000000e+00> : vector<16x128xf32>
    %9 = tpu.matmul %7, %8, %cst {dimension_numbers = #tpu.dot_dimension_numbers<[1], [0], [0], [1], [0, 0, 1, 1], [], []>} : vector<16x256xbf16>, vector<256x128xbf16>, vector<16x128xf32> -> vector<16x128xf32>
    %10 = vector.broadcast %0 : vector<1x128xf32> to vector<16x128xf32>
    %11 = arith.addf %9, %10 : vector<16x128xf32>
    %cst_10 = arith.constant dense<0.000000e+00> : vector<16xf32>
    %12 = vector.multi_reduction <add>, %11, %cst_10 [1] : vector<16x128xf32> to vector<16xf32>
    %13 = vector.shape_cast %12 : vector<16xf32> to vector<16x1xf32>
    %cst_11 = arith.constant 1.280000e+02 : f32
    %14 = vector.broadcast %cst_11 : f32 to vector<16x1xf32>
    %15 = arith.divf %13, %14 : vector<16x1xf32>
    %16 = arith.mulf %11, %11 : vector<16x128xf32>
    %cst_12 = arith.constant dense<0.000000e+00> : vector<16xf32>
    %17 = vector.multi_reduction <add>, %16, %cst_12 [1] : vector<16x128xf32> to vector<16xf32>
    %18 = vector.shape_cast %17 : vector<16xf32> to vector<16x1xf32>
    %cst_13 = arith.constant 1.280000e+02 : f32
    %19 = vector.broadcast %cst_13 : f32 to vector<16x1xf32>
    %20 = arith.divf %18, %19 : vector<16x1xf32>
    %21 = arith.mulf %15, %15 : vector<16x1xf32>
    %22 = arith.subf %20, %21 : vector<16x1xf32>
    %cst_14 = arith.constant 0.000000e+00 : f32
    %23 = vector.broadcast %cst_14 : f32 to vector<16x1xf32>
    %24 = arith.maximumf %22, %23 : vector<16x1xf32>
    %25 = vector.broadcast %15 : vector<16x1xf32> to vector<16x128xf32>
    %26 = arith.subf %11, %25 : vector<16x128xf32>
    %cst_15 = arith.constant 9.99999996E-13 : f32
    %27 = vector.broadcast %cst_15 : f32 to vector<16x1xf32>
    %28 = arith.addf %24, %27 : vector<16x1xf32>
    %29 = math.rsqrt %28 : vector<16x1xf32>
    %30 = vector.broadcast %29 : vector<16x1xf32> to vector<16x128xf32>
    %31 = arith.mulf %26, %30 : vector<16x128xf32>
    %32 = vector.broadcast %1 : vector<1x128xf32> to vector<16x128xf32>
    %33 = arith.mulf %31, %32 : vector<16x128xf32>
    %34 = vector.broadcast %2 : vector<1x128xf32> to vector<16x128xf32>
    %35 = arith.addf %33, %34 : vector<16x128xf32>
    %c0_16 = arith.constant 0 : index
    %c0_17 = arith.constant 0 : index
    %36 = vector.load %arg2[%c0_16, %c0_17] : memref<16x8xf32, #tpu.memory_space<vmem>>, vector<16x8xf32>
    %c0_18 = arith.constant 0 : index
    %c0_19 = arith.constant 0 : index
    %37 = vector.load %arg4[%c0_18, %c0_19] : memref<8x128xf32, #tpu.memory_space<vmem>>, vector<8x128xf32>
    %cst_20 = arith.constant dense<0.000000e+00> : vector<16x128xf32>
    %38 = tpu.matmul %36, %37, %cst_20 {dimension_numbers = #tpu.dot_dimension_numbers<[1], [0], [0], [1], [0, 0, 1, 1], [], []>} : vector<16x8xf32>, vector<8x128xf32>, vector<16x128xf32> -> vector<16x128xf32>
    %39 = vector.broadcast %3 : vector<1x128xf32> to vector<16x128xf32>
    %40 = arith.addf %38, %39 : vector<16x128xf32>
    %cst_21 = arith.constant dense<0.000000e+00> : vector<16xf32>
    %41 = vector.multi_reduction <add>, %40, %cst_21 [1] : vector<16x128xf32> to vector<16xf32>
    %42 = vector.shape_cast %41 : vector<16xf32> to vector<16x1xf32>
    %cst_22 = arith.constant 1.280000e+02 : f32
    %43 = vector.broadcast %cst_22 : f32 to vector<16x1xf32>
    %44 = arith.divf %42, %43 : vector<16x1xf32>
    %45 = arith.mulf %40, %40 : vector<16x128xf32>
    %cst_23 = arith.constant dense<0.000000e+00> : vector<16xf32>
    %46 = vector.multi_reduction <add>, %45, %cst_23 [1] : vector<16x128xf32> to vector<16xf32>
    %47 = vector.shape_cast %46 : vector<16xf32> to vector<16x1xf32>
    %cst_24 = arith.constant 1.280000e+02 : f32
    %48 = vector.broadcast %cst_24 : f32 to vector<16x1xf32>
    %49 = arith.divf %47, %48 : vector<16x1xf32>
    %50 = arith.mulf %44, %44 : vector<16x1xf32>
    %51 = arith.subf %49, %50 : vector<16x1xf32>
    %cst_25 = arith.constant 0.000000e+00 : f32
    %52 = vector.broadcast %cst_25 : f32 to vector<16x1xf32>
    %53 = arith.maximumf %51, %52 : vector<16x1xf32>
    %54 = vector.broadcast %44 : vector<16x1xf32> to vector<16x128xf32>
    %55 = arith.subf %40, %54 : vector<16x128xf32>
    %cst_26 = arith.constant 9.99999996E-13 : f32
    %56 = vector.broadcast %cst_26 : f32 to vector<16x1xf32>
    %57 = arith.addf %53, %56 : vector<16x1xf32>
    %58 = math.rsqrt %57 : vector<16x1xf32>
    %59 = vector.broadcast %58 : vector<16x1xf32> to vector<16x128xf32>
    %60 = arith.mulf %55, %59 : vector<16x128xf32>
    %61 = vector.broadcast %4 : vector<1x128xf32> to vector<16x128xf32>
    %62 = arith.mulf %60, %61 : vector<16x128xf32>
    %63 = vector.broadcast %5 : vector<1x128xf32> to vector<16x128xf32>
    %64 = arith.addf %62, %63 : vector<16x128xf32>
    %65 = arith.addf %35, %64 : vector<16x128xf32>
    %cst_27 = arith.constant 5.000000e-01 : f32
    %66 = vector.broadcast %cst_27 : f32 to vector<16x128xf32>
    %67 = arith.mulf %65, %66 : vector<16x128xf32>
    %68 = arith.truncf %67 : vector<16x128xf32> to vector<16x128xbf16>
    %c0_28 = arith.constant 0 : index
    %c0_29 = arith.constant 0 : index
    %69 = vector.load %arg6[%c0_28, %c0_29] : memref<16x128xbf16, #tpu.memory_space<vmem>>, vector<16x128xbf16>
    tpu.vector_store %arg6[%c0_28, %c0_29], %68 {strides = array<i32>} : memref<16x128xbf16, #tpu.memory_space<vmem>>, vector<16x128xbf16>,
    return
  }
  func.func @transform_0(%arg0: i32) -> (i32, i32) {
    %c0_i32 = arith.constant 0 : i32
    %c0_i32_0 = arith.constant 0 : i32
    return %arg0, %c0_i32 : i32, i32
  }
  func.func @transform_1(%arg0: i32) -> (i32, i32) {
    %c0_i32 = arith.constant 0 : i32
    %c0_i32_0 = arith.constant 0 : i32
    return %arg0, %c0_i32 : i32, i32
  }
  func.func @transform_2(%arg0: i32) -> (i32, i32) {
    %c0_i32 = arith.constant 0 : i32
    %c0_i32_0 = arith.constant 0 : i32
    %c0_i32_1 = arith.constant 0 : i32
    return %c0_i32, %c0_i32_0 : i32, i32
  }
  func.func @transform_3(%arg0: i32) -> (i32, i32) {
    %c0_i32 = arith.constant 0 : i32
    %c0_i32_0 = arith.constant 0 : i32
    %c0_i32_1 = arith.constant 0 : i32
    return %c0_i32, %c0_i32_0 : i32, i32
  }
  func.func @transform_4(%arg0: i32) -> (i32, i32) {
    %c0_i32 = arith.constant 0 : i32
    %c0_i32_0 = arith.constant 0 : i32
    %c0_i32_1 = arith.constant 0 : i32
    return %c0_i32, %c0_i32_0 : i32, i32
  }
  func.func @transform_5(%arg0: i32) -> (i32, i32) {
    %c0_i32 = arith.constant 0 : i32
    %c0_i32_0 = arith.constant 0 : i32
    return %arg0, %c0_i32 : i32, i32
  }
}

</mosaic_0001>

<bundles_post_ra>
// kernel: tpu_custom_call.1
= control target key start
LH: loop header
LB: loop body
LE: loop exit
PB: predicated region body
PF: predicated region fallthrough
CT: control target
= control target key end

     0   :  { %s1429_s0 = inlined_call_operand.hbm [shape: f32[18,256], index: 0, kind: input, shape index: {}]   ;;  %s1430_s1 = inlined_call_operand.vmem [shape: f32[18,8], index: 1, kind: input, shape index: {}]   ;;  %s1431_s2 = inlined_call_operand.hbm [shape: bf16[256,128], index: 2, kind: input, shape index: {}]   ;;  %s1432_s3 = inlined_call_operand.vmem [shape: f32[8,128], index: 3, kind: input, shape index: {}]   ;;  %s1433_s4 = inlined_call_operand.vmem [shape: f32[8,128], index: 4, kind: input, shape index: {}]   ;;  %s1434_s5 = inlined_call_operand.hbm [shape: bf16[18,128], index: 5, kind: output, shape index: {}]  }
   0x1   :  { %1438 = sst [smem:[#allocation11_spill]] %s1431_s2 }
   0x2   :  { %10 = vsyncpa [#allocation3], 0 }
   0x3   :  { %12 = vsyncpa [#allocation3 + $0x1], 0 }
   0x4   :  { %13 = vsyncpa [#allocation6], 0 }
   0x5   :  { %14 = vsyncpa [#allocation4], 0 }
   0x6   :  { %16 = vsyncpa [#allocation4 + $0x1], 0  ;;  %s1148_s18 = smov 0   ;;  %s1150_s19 = smov 0  }
   0x7   :  { %s1152_s20 = smov 0   ;;  %s1154_s21 = smov 0  }
   0x8 LB: > { %s1169_s22 = sadd.s32 4294967295, %s1106_s21   ;;  %s764_s23 = sadd.s32 4294967294, %s1106_s21   ;;  %s1106_s21 = sphi %s1154_s21, %s1457_s21   ;;  %s1102_s20 = sphi %s1152_s20, %s1456_s20   ;;  %s1098_s19 = sphi %s1150_s19, %s1455_s19   ;;  %s1094_s18 = sphi %s1148_s18, %s1454_s18  }
   0x9   : > { %s1173_s24 = sadd.s32 1, %s1106_s21   ;;  %s29_s25 = sadd.s32 1, %s1102_s20 }
   0xa   : > { %s26_s26 = ssub.s32 %s1106_s21, %s1173_s24  ;;  %p36_p0 = scmp.ne.s32.totalorder %s1102_s20, %s1098_s19 }
   0xb   : > { %p27_p1 = scmp.eq.s32.totalorder %s26_s26, 0  ;;  %p37_p2 = scmp.eq.s32.totalorder %s1106_s21, 0 }
   0xc   : > { %p42_p3 = scmp.ne.s32.totalorder %s1098_s19, %s1094_s18  ;;  %p1437_p4 = scmp.eq.s32.totalorder %s1169_s22, 0 }
   0xd   : > { %s1185_s27 = scalar_select %p27_p1, %s1102_s20, %s29_s25  }
   0xe   : > { %p1187_p5 = por %p37_p2, %p36_p0  ;;  %p1193_p6 = por %p1437_p4, %p42_p3 }
   0xf   : > { %p155_p7 = scmp.eq.s32.totalorder %s1169_s22, 1  ;;  %p161_p8 = scmp.eq.s32.totalorder %s764_s23, 1 }
  0x10   : > { %p765_p9 = scmp.ge.s32.totalorder %s1106_s21, 1  ;;  %p168_p10 = scmp.lt.s32.totalorder %s1106_s21, 3 }
  0x11   : > { %p1200_p11 = por %p155_p7, %p36_p0  ;;  %p1204_p12 = por %p161_p8, %p42_p3 }
  0x12   : > { %p1208_p13 = pnand %p765_p9, %p168_p10  ;;  %s1444_s2 = sld [smem:[#allocation11_spill]] }
  0x13   : > { %s1442_s6 = scalar_select %p1204_p12, 1, 0 }
  0x14   : > { %p889_p1 = pneg %p1208_p13  ;;  %s1108_s11 = smov [#allocation5]  }
  0x15   : > { %s181_s12 = sshll.u32 %s1108_s11, 4  ;;  %s1109_s13 = smov 64   ;;  %s182_s12 = int_to_ptr.vmem [resolvable:$true] %s181_s12 }
  0x16   : > { %p890_p0 = pnand %p889_p1, %p1437_p4  ;;  %s1110_s14 = smov 4  }
  0x17   : > { %p1436_p2 = scmp.ge.s32.totalorder %s1106_s21, 2 }
  0x18   : > { %s179_s10 = sshll.u32 %s1444_s2, 4  ;;  %s180_s10 = int_to_ptr.hbm [resolvable:$true] %s179_s10 }
  0x19   : > { %892 = dma.hbm_to_vmem [thread:$0]  (!%p890_p0), %s180_s10, 2048, %s182_s12, [#allocation6], %s1109_s13, %s1109_s13, %s1110_s14  }
  0x1a   : > { %197 = sbr.rel (%p1436_p2) target bundleno = 68 (0x44), region = 28 }
  0x1f   : > { %200 = sbr.rel (!%p1187_p5) target bundleno = 68 (0x44), region = 32  ;;  %s201_s15 = sand.u32 (%p1187_p5), 1, %s1102_s20  }
  0x20   : > { %s769_s16 = sshll.u32 (%p1187_p5), %s1106_s21, 1  ;;  %s768_s17 = sshll.u32 (%p1187_p5), %s201_s15, 5 }
  0x21   : > { %s207_s23 = ssub.s32 (%p1187_p5), 3, %s769_s16  ;;  %s1229_s9 = scalar_lea.sflag (%p1187_p5), [#allocation3], %s201_s15 }
  0x22   : > { %p208_p3 = scmp.lt.s32.totalorder (%p1187_p5), %s207_s23, 2  ;;  %s205_s10 = scalar_lea.vmem (%p1187_p5), [#allocation2], %s768_s17 }
  0x24   : > { %s1459_s23 = smov (!%p208_p3, %s207_s23), 2 }
  0x25   : > { %s858_s25 = sshll.u32 %s1459_s23, 4 }
  0x26   : > { %s212_s26 = ssub.s32 32, %s858_s25 }
  0x27   : > { %s213_s8 = sshll.u32 %s212_s26, 4 }
  0x28   : > { %214 = vsyncadd %s1229_s9, %s213_s8  ;;  %p1232_p5 = scmp.ne.s32.totalorder %s858_s25, 0  ;;  %s860_s11 = sshll.u32 %s1106_s21, 5 }
  0x29   : > { %s218_s14 = scalar_lea.hbm %s1429_s0, %s860_s11  ;;  %s1240_s16 = sshll.u32 %s205_s10, 4  ;;  %s223_s16 = int_to_ptr.vmem [resolvable:$true] %s1240_s16 }
  0x2a   : > { %s220_s15 = sshll.u32 %s218_s14, 4  ;;  %s1435_s17 = sshll.u32 %s1459_s23, 8  ;;  %s1243_s15 = int_to_ptr.hbm [resolvable:$true] %s220_s15 }
  0x2b   : > { %s986_s26 = sshra.s32 %s1243_s15, 4  ;;  %s988_s25 = sshrl.u32 %s1435_s17, 4  ;;  %s987_s26 = int_to_ptr.hbm [resolvable:$true] %s986_s26 }
  0x2c   : > { %s993_s8 = scalar_lea.hbm %s987_s26, %s988_s25  ;;  %s997_s10 = scalar_lea.hbm %s1429_s0, 48 }
  0x2d   : > { %p994_p7 = scmp.ne.s32.totalorder %s987_s26, %s993_s8  ;;  %p998_p10 = scmp.lt.s32.totalorder %s987_s26, %s1429_s0 }
  0x2e   : > { %p999_p1 = scmp.lt.s32.totalorder %s997_s10, %s993_s8 }
  0x2f   : > { %p995_p8 = pnand %p994_p7, %p1232_p5 }
  0x30   : > { %p1000_p0 = por %p999_p1, %p998_p10 }
  0x31   : > { %p996_p9 = pneg %p995_p8 }
  0x33   : > { %p1001_p3 = pnand %p1000_p0, %p996_p9 }
  0x35   : > { %1004 = shalt.err (!%p1001_p3)
}
  0x36   : > { %s1005_s17 = sshra.s32 %s223_s16, 4  ;;  %s1111_s12 = smov [#allocation2]   ;;  %s1006_s17 = int_to_ptr.vmem [resolvable:$true] %s1005_s17 }
  0x37   : > { %s1012_s2 = scalar_lea.vmem %s1006_s17, %s988_s25  ;;  %s1016_s11 = scalar_lea.vmem %s1111_s12, 64 }
  0x38   : > { %p1013_p7 = scmp.ne.s32.totalorder %s1006_s17, %s1012_s2  ;;  %p1018_p4 = scmp.lt.s32.totalorder %s1016_s11, %s1012_s2 }
  0x3a   : > { %p1014_p8 = pnand %p1013_p7, %p1232_p5 }
  0x3c   : > { %p1015_p2 = pneg %p1014_p8 }
  0x3e   : > { %p1020_p12 = pnand %p1018_p4, %p1015_p2 }
  0x40   : > { %1023 = shalt.err (!%p1020_p12)
}
  0x41   : > { %s1112_s26 = smov 256   ;;  %s1113_s8 = smov 16  }
  0x42   : > { %s1446_s10 = sshll.u32 %s1459_s23, 8 }
  0x43   : > { %228 = dma.hbm_to_vmem [thread:$0]  (%p1232_p5), %s1243_s15, %s1446_s10, %s223_s16, %s1229_s9, %s1112_s26, %s1112_s26, %s1113_s8  }
  0x44 PF: > { %251 = sbr.rel (%p1208_p13) target bundleno = 441 (0x1b9), region = 40  ;;  %s1272_s2 = sand.u32 (!%p1208_p13), 1, %s1098_s19  }
  0x45   : > { %s778_s17 = sshll.u32 (!%p1208_p13), %s1272_s2, 5  ;;  %s254_s25 = scalar_lea.sflag (!%p1208_p13), [#allocation3], %s1272_s2 }
  0x46   : > { %s1276_s13 = scalar_lea.vmem (!%p1208_p13), [#allocation2], %s778_s17 }
  0x49   : > { %1081 = dma.done.wait (%p1193_p6), %s254_s25, 512  }
  0x4a   : > { %1083 = vsyncadd (%p1193_p6), %s254_s25, 4294966784  ;;  %p1447_p4 = scmp.eq.s32.totalorder %s1169_s22, 0 }
  0x4c   : > { %1085 = dma.done.wait (%p1447_p4), [#allocation6], 2048   ;;  %p1448_p12 = pmov %p1447_p4 }
  0x4d   : > { %s1287_s7 = sshll.u32 %s1169_s22, 1  ;;  %vm556_vm0 = vcmask 64512   ;;  %v554_v0 = vld [vmem:[%s1432_s3] sm:$0xff]  ;;  %v868_v2 = vld [vmem:[#allocation5 + $0x38] sm:$0xff]  ;;  %v867_v4 = vld [vmem:[#allocation5 + $0x30] sm:$0xff]  ;;  %v1114_v43 = vmov 128.0  }
  0x4e   : > { %1087 = vsyncadd (%p1448_p12), [#allocation6], 4294965248  ;;  %p310_p13 = scmp.lt.s32.totalorder %s1287_s7, 2  ;;  %578 = vmatpush.msra.mxu2 %v554_v0  ;;  %v876_v3 = vld [vmem:[#allocation5 + $0x78] sm:$0xff]  ;;  %465 = vmatpush.bf16.msra.mxu0 %v868_v2  ;;  %v875_v5 = vld [vmem:[#allocation5 + $0x70] sm:$0xff]  ;;  %946 = vrcp.f32 %v1114_v43  ;;  %s647_s14 = scalar_lea.sflag [#allocation4], %s1272_s2 }
  0x4f   : > { %479 = vmatpush.bf16.msra.mxu1 %v876_v3  ;;  %v866_v6 = vld [vmem:[#allocation5 + $0x28] sm:$0xff]  ;;  %v865_v9 = vld [vmem:[#allocation5 + $0x20] sm:$0xff]  ;;  %v864_v11 = vld [vmem:[#allocation5 + $0x18] sm:$0xff]  ;;  %s655_s12 = ssub.s32 (%p1200_p11), 3, %s1287_s7 }
  0x50   : > { %s311_s23 = scalar_select %p310_p13, %s1287_s7, 2  ;;  %v874_v8 = vld [vmem:[#allocation5 + $0x68] sm:$0xff]  ;;  %v873_v10 = vld [vmem:[#allocation5 + $0x60] sm:$0xff]  ;;  %v872_v12 = vld [vmem:[#allocation5 + $0x58] sm:$0xff] }
  0x51   : > { %v863_v13 = vld [vmem:[#allocation5 + $0x10] sm:$0xff]  ;;  %v862_v15 = vld [vmem:[#allocation5 + $0x8] sm:$0xff]  ;;  %v861_v17 = vld [vmem:[#allocation5] sm:$0xff]  ;;  %p656_p6 = scmp.lt.s32.totalorder (%p1200_p11), %s655_s12, 2 }
  0x52   : > { %s782_s9 = sshll.u32 %s311_s23, 3  ;;  %466 = vmatpush.bf16.msra.mxu0 %v867_v4  ;;  %v871_v14 = vld [vmem:[#allocation5 + $0x50] sm:$0xff]  ;;  %v870_v16 = vld [vmem:[#allocation5 + $0x48] sm:$0xff]  ;;  %v330_v18 = vld [vmem:[%s1276_s13] sm:$0xff] }
  0x53   : > { %s313_s15 = scalar_lea.vmem %s1430_s1, %s782_s9  ;;  %480 = vmatpush.bf16.msra.mxu1 %v875_v5  ;;  %v332_v19 = vld [vmem:[%s1276_s13 + $0x10] sm:$0xff]  ;;  %v869_v20 = vld [vmem:[#allocation5 + $0x40] sm:$0xff]  ;;  %v331_v21 = vld [vmem:[%s1276_s13 + $0x8] sm:$0xff] }
  0x54   : > { %v552_v1 = vld [vmem:[%s313_s15] sm:$0xff]  ;;  %v553_v7 = vld [vmem:[%s313_s15 + $0x8] sm:$0xff]  ;;  %v333_v22 = vld [vmem:[%s1276_s13 + $0x18] sm:$0xff]  ;;  %v334_v23 = vpack.c.bf16 %v332_v19, %v330_v18  ;;  %v947_v44 = vpop.eup %946  ;;  %s780_s15 = sshll.u32 %s1272_s2, 3 }
  0x55   : > { %847 = vmatmul.msk.f32.vlgmr.msra.gmra.mxu2 %vm556_vm0, %v552_v1  ;;  %v335_v24 = vpack.c.bf16 %v333_v22, %v331_v21  ;;  %v940_v25 = vld [vmem:[%s1433_s4 + $0x3] ss:$0 sm:$0xff]  ;;  %v941_v31 = vld [vmem:[%s1433_s4] ss:$0 sm:$0xff]  ;;  %v498_v45 = vmul.f32 128.0, %v947_v44  ;;  %vm502_vm1 = vweird.f32 %v947_v44  ;;  %s298_s29 = scalar_lea.vmem [#allocation7], %s780_s15 }
  0x56   : > { %467 = vmatpush.bf16.msra.mxu0 %v866_v6 }
  0x57   : > { %481 = vmatpush.bf16.msra.mxu1 %v874_v8  ;;  %v499_v47 = vsub.f32 1.0, %v498_v45 }
  0x59   : > { %v500_v48 = vmul.f32 %v947_v44, %v499_v47 }
  0x5a   : > { %468 = vmatpush.bf16.msra.mxu0 %v865_v9 }
  0x5b   : > { %482 = vmatpush.bf16.msra.mxu1 %v873_v10  ;;  %v501_v50 = vadd.f32 %v947_v44, %v500_v48 }
  0x5d   : > { %848 = vmatmul.msk.f32.gmra.mxu2 %vm556_vm0, %v553_v7  ;;  %v503_v51 = vsel %vm502_vm1, %v947_v44, %v501_v50 }
  0x5e   : > { %469 = vmatpush.bf16.msra.mxu0 %v864_v11 }
  0x5f   : > { %483 = vmatpush.bf16.msra.mxu1 %v872_v12 }
  0x62   : > { %470 = vmatpush.bf16.msra.mxu0 %v863_v13 }
  0x63   : > { %484 = vmatpush.bf16.msra.mxu1 %v871_v14 }
  0x66   : > { %471 = vmatpush.bf16.msra.mxu0 %v862_v15 }
  0x67   : > { %485 = vmatpush.bf16.msra.mxu1 %v870_v16 }
  0x6a   : > { %472 = vmatpush.bf16.msra.mxu0 %v861_v17 }
  0x6b   : > { %486 = vmatpush.bf16.msra.mxu1 %v869_v20 }
  0x6d   : > { %473 = vmatmul.bf16.vlgmr.msra.gmra.mxu0 %v334_v23 }
  0x6e   : > { %487 = vmatmul.bf16.vlgmr.msra.gmra.mxu1 %v335_v24 }
  0xd8   : > { %v580_v26 = vpop.f32.mrf.mxu2 }
  0xd9   : > { %v1306_v27 = vadd.f32 %v940_v25, %v580_v26 }
  0xdb   : > { %586 = vadd.xlane.f32.xlu1 %v1306_v27  ;;  %v592_v42 = vmul.f32 %v1306_v27, %v1306_v27 }
  0xe0   : > { %v583_v28 = vpop.f32.mrf.mxu2 }
  0xe1   : > { %v1309_v29 = vadd.f32 %v940_v25, %v583_v28 }
  0xe3   : > { %588 = vadd.xlane.f32.xlu1 %v1309_v29  ;;  %v593_v30 = vmul.f32 %v1309_v29, %v1309_v29 }
  0xea   : > { %v474_v32 = vpop.f32.mrf.mxu0 }
  0xeb   : > { %596 = vadd.xlane.f32.xlu1 %v593_v30  ;;  %v475_v33 = vadd.f32 %v941_v31, %v474_v32  ;;  %v488_v34 = vpop.f32.mrf.mxu1 }
  0xed   : > { %v1317_v35 = vadd.f32 %v488_v34, %v475_v33 }
  0xef   : > { %493 = vadd.xlane.f32.xlu0 %v1317_v35  ;;  %v506_v36 = vmul.f32 %v1317_v35, %v1317_v35 }
  0xf1   : > { %508 = vadd.xlane.f32.xlu2 %v506_v36 }
  0xf2   : > { %v476_v37 = vpop.f32.mrf.mxu0 }
  0xf3   : > { %v477_v38 = vadd.f32 %v941_v31, %v476_v37  ;;  %v490_v39 = vpop.f32.mrf.mxu1 }
  0xf5   : > { %v1322_v40 = vadd.f32 %v490_v39, %v477_v38 }
  0xf7   : > { %495 = vadd.xlane.f32.xlu0 %v1322_v40  ;;  %v507_v41 = vmul.f32 %v1322_v40, %v1322_v40 }
  0xf9   : > { %510 = vadd.xlane.f32.xlu2 %v507_v41 }
  0xff   : > { %594 = vadd.xlane.f32.xlu0 %v592_v42 }
 0x14e   : > { %v587_v46 = vpop.xlane.xlu1 %586 }
 0x14f   : > { %v1337_v11 = vmul.f32 %v587_v46, %v503_v51 }
 0x151   : > { %v600_v15 = vmul.f32 %v1337_v11, %v1337_v11 }
 0x156   : > { %v589_v49 = vpop.xlane.xlu1 %588 }
 0x157   : > { %v1329_v52 = vmul.f32 %v589_v49, %v503_v51  ;;  %v942_v49 = vld [vmem:[%s1433_s4 + $0x4] ss:$0 sm:$0xff] }
 0x159   : > { %v601_v53 = vmul.f32 %v1329_v52, %v1329_v52  ;;  %v607_v44 = vsub.f32 %v1309_v29, %v1329_v52  ;;  %v944_v29 = vld [vmem:[%s1433_s4 + $0x1] ss:$0 sm:$0xff] }
 0x15e   : > { %v597_v54 = vpop.xlane.xlu1 %596 }
 0x15f   : > { %v599_v55 = vmul.f32 %v597_v54, %v503_v51 }
 0x161   : > { %v603_v56 = vsub.f32 %v599_v55, %v601_v53 }
 0x162   : > { %v494_v58 = vpop.xlane.xlu0 %493 }
 0x163   : > { %v605_v57 = vmax.f32 %v603_v56, 0.0  ;;  %v1333_v60 = vmul.f32 %v503_v51, %v494_v58 }
 0x164   : > { %v509_v61 = vpop.xlane.xlu2 %508 }
 0x165   : > { %v609_v59 = vadd.f32 1e-12, %v605_v57  ;;  %v514_v62 = vmul.f32 %v1333_v60, %v1333_v60  ;;  %v512_v63 = vmul.f32 %v509_v61, %v503_v51  ;;  %v606_v57 = vsub.f32 %v1306_v27, %v1337_v11 }
 0x167   : > { %948 = vrsqrt.f32 %v609_v59  ;;  %v516_v0 = vsub.f32 %v512_v63, %v514_v62  ;;  %vm626_vm2 = vweird.f32 %v609_v59 }
 0x169   : > { %v518_v1 = vmax.f32 %v516_v0, 0.0 }
 0x16a   : > { %v496_v2 = vpop.xlane.xlu0 %495 }
 0x16b   : > { %v522_v3 = vadd.f32 1e-12, %v518_v1  ;;  %v505_v4 = vmul.f32 %v503_v51, %v496_v2 }
 0x16c   : > { %v511_v5 = vpop.xlane.xlu2 %510 }
 0x16d   : > { %v949_v6 = vpop.eup %948  ;;  %950 = vrsqrt.f32 %v522_v3  ;;  %v515_v7 = vmul.f32 %v505_v4, %v505_v4  ;;  %v513_v8 = vmul.f32 %v511_v5, %v503_v51  ;;  %vm530_vm7 = vweird.f32 %v522_v3 }
 0x16e   : > { %v621_v9 = vmul.f32 %v949_v6, %v609_v59  ;;  %vm627_vm3 = vweird.f32 %v949_v6  ;;  %v521_v47 = vsub.f32 %v1322_v40, %v505_v4  ;;  %v945_v59 = vld [vmem:[%s1433_s4 + $0x2] ss:$0 sm:$0xff] }
 0x16f   : > { %v517_v10 = vsub.f32 %v513_v8, %v515_v7  ;;  %vm1341_vm4 = vmor %vm626_vm2, %vm627_vm3 }
 0x170   : > { %v622_v17 = vmul.f32 %v949_v6, %v621_v9 }
 0x171   : > { %v519_v12 = vmax.f32 %v517_v10, 0.0 }
 0x172   : > { %v595_v13 = vpop.xlane.xlu0 %594  ;;  %v623_v23 = vmul.f32 0.5, %v622_v17 }
 0x173   : > { %v951_v14 = vpop.eup %950  ;;  %v598_v16 = vmul.f32 %v595_v13, %v503_v51  ;;  %v523_v19 = vadd.f32 1e-12, %v519_v12  ;;  %v520_v51 = vsub.f32 %v1317_v35, %v1333_v60  ;;  %v943_v35 = vld [vmem:[%s1433_s4 + $0x5] ss:$0 sm:$0xff] }
 0x174   : > { %v525_v18 = vmul.f32 %v951_v14, %v522_v3  ;;  %v624_v28 = vsub.f32 1.5, %v623_v23  ;;  %vm531_vm5 = vweird.f32 %v951_v14 }
 0x175   : > { %v602_v20 = vsub.f32 %v598_v16, %v600_v15  ;;  %952 = vrsqrt.f32 %v523_v19  ;;  %vm532_vm8 = vmor %vm530_vm7, %vm531_vm5  ;;  %vm540_vm9 = vweird.f32 %v523_v19 }
 0x176   : > { %v526_v21 = vmul.f32 %v951_v14, %v525_v18  ;;  %v625_v33 = vmul.f32 %v949_v6, %v624_v28 }
 0x177   : > { %v604_v22 = vmax.f32 %v602_v20, 0.0 }
 0x178   : > { %v527_v25 = vmul.f32 0.5, %v526_v21  ;;  %v629_v42 = vsel %vm1341_vm4, %v949_v6, %v625_v33 }
 0x179   : > { %v608_v24 = vadd.f32 1e-12, %v604_v22  ;;  %v631_v50 = vmul.f32 %v629_v42, %v607_v44 }
 0x17a   : > { %v528_v31 = vsub.f32 1.5, %v527_v25 }
 0x17b   : > { %954 = vrsqrt.f32 %v608_v24  ;;  %v953_v26 = vpop.eup %952  ;;  %vm616_vm12 = vweird.f32 %v608_v24  ;;  %v634_v58 = vmul.f32 %v942_v49, %v631_v50 }
 0x17c   : > { %v535_v30 = vmul.f32 %v953_v26, %v523_v19  ;;  %v529_v38 = vmul.f32 %v951_v14, %v528_v31  ;;  %vm541_vm6 = vweird.f32 %v953_v26 }
 0x17d   : > { %vm542_vm10 = vmor %vm540_vm9, %vm541_vm6  ;;  %v637_v0 = vadd.f32 %v943_v35, %v634_v58 }
 0x17e   : > { %v536_v32 = vmul.f32 %v953_v26, %v535_v30  ;;  %v533_v46 = vsel %vm532_vm8, %v951_v14, %v529_v38 }
 0x17f   : > { %v544_v55 = vmul.f32 %v533_v46, %v520_v51 }
 0x180   : > { %v537_v37 = vmul.f32 0.5, %v536_v32 }
 0x181   : > { %v955_v34 = vpop.eup %954  ;;  %v547_v61 = vmul.f32 %v944_v29, %v544_v55 }
 0x182   : > { %v611_v39 = vmul.f32 %v955_v34, %v608_v24  ;;  %v538_v41 = vsub.f32 1.5, %v537_v37  ;;  %vm617_vm11 = vweird.f32 %v955_v34 }
 0x183   : > { %vm618_vm13 = vmor %vm616_vm12, %vm617_vm11  ;;  %v550_v2 = vadd.f32 %v945_v59, %v547_v61 }
 0x184   : > { %v612_v43 = vmul.f32 %v955_v34, %v611_v39  ;;  %v539_v45 = vmul.f32 %v953_v26, %v538_v41 }
 0x186   : > { %v613_v48 = vmul.f32 0.5, %v612_v43  ;;  %v543_v53 = vsel %vm542_vm10, %v953_v26, %v539_v45 }
 0x187   : > { %v545_v52 = vmul.f32 %v543_v53, %v521_v47 }
 0x188   : > { %v614_v54 = vsub.f32 1.5, %v613_v48 }
 0x189   : > { %v548_v40 = vmul.f32 %v944_v29, %v545_v52 }
 0x18a   : > { %v615_v56 = vmul.f32 %v955_v34, %v614_v54 }
 0x18b   : > { %v551_v62 = vadd.f32 %v945_v59, %v548_v40 }
 0x18c   : > { %v619_v60 = vsel %vm618_vm13, %v955_v34, %v615_v56 }
 0x18d   : > { %v630_v63 = vmul.f32 %v619_v60, %v606_v57  ;;  %v639_v3 = vadd.f32 %v637_v0, %v551_v62 }
 0x18f   : > { %v633_v1 = vmul.f32 %v942_v49, %v630_v63  ;;  %v641_v5 = vmul.f32 0.5, %v639_v3 }
 0x191   : > { %v636_v27 = vadd.f32 %v943_v35, %v633_v1 }
 0x193   : > { %v638_v4 = vadd.f32 %v636_v27, %v550_v2 }
 0x195   : > { %v640_v6 = vmul.f32 0.5, %v638_v4  ;;  %653 = sbr.rel (!%p1200_p11) target bundleno = 441 (0x1b9), region = 52 }
 0x197   : > { %v881_v7 = vpack.c.bf16 %v641_v5, %v640_v6 }
 0x199   : > { %882 = vst [vmem:[%s298_s29] sm:$0xff] %v881_v7  }
 0x19a   : > { %s1461_s12 = smov (!%p656_p6, %s655_s12), 2 }
 0x19b   : > { %s851_s11 = sshll.u32 %s1461_s12, 2 }
 0x19c   : > { %s659_s26 = ssub.s32 8, %s851_s11 }
 0x19d   : > { %s660_s8 = sshll.u32 %s659_s26, 4 }
 0x19e   : > { %661 = vsyncadd %s647_s14, %s660_s8  ;;  %p1376_p2 = scmp.ne.s32.totalorder %s851_s11, 0  ;;  %s877_s30 = sshll.u32 %s1169_s22, 3 }
 0x19f   : > { %s664_s25 = scalar_lea.hbm %s1434_s5, %s877_s30  ;;  %s666_s13 = sshll.u32 %s298_s29, 4  ;;  %s1384_s13 = int_to_ptr.vmem [resolvable:$true] %s666_s13 }
 0x1a0   : > { %s668_s23 = sshll.u32 %s664_s25, 4  ;;  %s855_s9 = sshll.u32 %s1461_s12, 6  ;;  %s1386_s23 = int_to_ptr.hbm [resolvable:$true] %s668_s23 }
 0x1a1   : > { %s1025_s28 = sshra.s32 %s1384_s13, 4  ;;  %s1027_s16 = sshrl.u32 %s855_s9, 4  ;;  %s1026_s28 = int_to_ptr.vmem [resolvable:$true] %s1025_s28 }
 0x1a2   : > { %s1032_s15 = scalar_lea.vmem %s1026_s28, %s1027_s16  ;;  %s1115_s22 = smov [#allocation7]  }
 0x1a3   : > { %p1033_p11 = scmp.ne.s32.totalorder %s1026_s28, %s1032_s15  ;;  %s1036_s11 = scalar_lea.vmem %s1115_s22, 16 }
 0x1a4   : > { %p1038_p10 = scmp.lt.s32.totalorder %s1036_s11, %s1032_s15 }
 0x1a5   : > { %p1034_p5 = pnand %p1033_p11, %p1376_p2 }
 0x1a7   : > { %p1035_p9 = pneg %p1034_p5 }
 0x1a9   : > { %p1040_p1 = pnand %p1038_p10, %p1035_p9 }
 0x1ab   : > { %1043 = shalt.err (!%p1040_p1)
}
 0x1ac   : > { %s1044_s29 = sshra.s32 %s1386_s23, 4  ;;  %s1055_s17 = scalar_lea.hbm %s1434_s5, 12  ;;  %s1045_s29 = int_to_ptr.hbm [resolvable:$true] %s1044_s29 }
 0x1ad   : > { %s1051_s26 = scalar_lea.hbm %s1045_s29, %s1027_s16  ;;  %p1056_p8 = scmp.lt.s32.totalorder %s1045_s29, %s1434_s5 }
 0x1ae   : > { %p1052_p0 = scmp.ne.s32.totalorder %s1045_s29, %s1051_s26  ;;  %p1057_p4 = scmp.lt.s32.totalorder %s1055_s17, %s1051_s26 }
 0x1b0   : > { %p1053_p3 = pnand %p1052_p0, %p1376_p2  ;;  %p1058_p12 = por %p1057_p4, %p1056_p8 }
 0x1b2   : > { %p1054_p7 = pneg %p1053_p3 }
 0x1b4   : > { %p1059_p13 = pnand %p1058_p12, %p1054_p7 }
 0x1b6   : > { %1062 = shalt.err (!%p1059_p13)
}
 0x1b7   : > { %s1116_s28 = smov 64   ;;  %s1117_s16 = smov 4  }
 0x1b8   : > { %674 = dma.vmem_to_hbm [thread:$0]  (%p1376_p2), %s1384_s13, %s855_s9, %s1386_s23, %s647_s14, %s1116_s28, %s1116_s28, %s1117_s16  }
 0x1b9 PF: > { %s683_s15 = sand.u32 1, %s1094_s18   ;;  %p1452_p6 = scmp.ne.s32.totalorder %s1442_s6, 0 }
 0x1ba   : > { %p1453_p11 = scmp.ge.s32.totalorder %s1106_s21, 2  ;;  %s684_s22 = scalar_lea.sflag [#allocation4], %s683_s15 }
 0x1bc   : > { %p894_p5 = pnand %p1453_p11, %p1452_p6 }
 0x1be   : > { %p895_p9 = pneg %p894_p5 }
 0x1c0   : > { %1089 = dma.done.wait (%p895_p9), %s684_s22, 128  }
 0x1c1   : > { %1091 = vsyncadd (%p895_p9), %s684_s22, 4294967168  ;;  %p19_p10 = scmp.ge.s32.totalorder %s1173_s24, 4   ;;  %s1454_s18 = smov %s1098_s19 }
 0x1c2   : > { %s1455_s19 = smov %s1102_s20  ;;  %s1456_s20 = smov %s1185_s27 }
 0x1c3   : > { %s1457_s21 = smov %s1173_s24  ;;  %21 = sbr.rel (!%p19_p10) target bundleno = 8 (0x8), region = 92 }
 0x1c8   :  { %690 = vsyncpa [#allocation3], 1 }
 0x1c9   :  { %692 = vsyncpa [#allocation3 + $0x1], 1 }
 0x1ca   :  { %693 = vsyncpa [#allocation6], 1 }
 0x1cb   :  { %694 = vsyncpa [#allocation4], 1 }
 0x1cc   :  { %696 = vsyncpa [#allocation4 + $0x1], 1 }

// kernel: tpu_custom_call.1
= control target key start
LH: loop header
LB: loop body
LE: loop exit
PB: predicated region body
PF: predicated region fallthrough
CT: control target
= control target key end

     0   :  { %s1429_s0 = inlined_call_operand.hbm [shape: f32[18,256], index: 0, kind: input, shape index: {}]   ;;  %s1430_s1 = inlined_call_operand.vmem [shape: f32[18,8], index: 1, kind: input, shape index: {}]   ;;  %s1431_s2 = inlined_call_operand.hbm [shape: bf16[256,128], index: 2, kind: input, shape index: {}]   ;;  %s1432_s3 = inlined_call_operand.vmem [shape: f32[8,128], index: 3, kind: input, shape index: {}]   ;;  %s1433_s4 = inlined_call_operand.vmem [shape: f32[8,128], index: 4, kind: input, shape index: {}]   ;;  %s1434_s5 = inlined_call_operand.hbm [shape: bf16[18,128], index: 5, kind: output, shape index: {}]  }
   0x1   :  { %1438 = sst [smem:[#allocation11_spill]] %s1431_s2 }
   0x2   :  { %10 = vsyncpa [#allocation3], 0 }
   0x3   :  { %12 = vsyncpa [#allocation3 + $0x1], 0 }
   0x4   :  { %13 = vsyncpa [#allocation6], 0 }
   0x5   :  { %14 = vsyncpa [#allocation4], 0 }
   0x6   :  { %16 = vsyncpa [#allocation4 + $0x1], 0  ;;  %s1148_s18 = smov 0   ;;  %s1150_s19 = smov 0  }
   0x7   :  { %s1152_s20 = smov 0   ;;  %s1154_s21 = smov 0  }
   0x8 LB: > { %s1169_s22 = sadd.s32 4294967295, %s1106_s21   ;;  %s764_s23 = sadd.s32 4294967294, %s1106_s21   ;;  %s1106_s21 = sphi %s1154_s21, %s1457_s21   ;;  %s1102_s20 = sphi %s1152_s20, %s1456_s20   ;;  %s1098_s19 = sphi %s1150_s19, %s1455_s19   ;;  %s1094_s18 = sphi %s1148_s18, %s1454_s18  }
   0x9   : > { %s1173_s24 = sadd.s32 1, %s1106_s21   ;;  %s29_s25 = sadd.s32 1, %s1102_s20 }
   0xa   : > { %s26_s26 = ssub.s32 %s1106_s21, %s1173_s24  ;;  %p36_p0 = scmp.ne.s32.totalorder %s1102_s20, %s1098_s19 }
   0xb   : > { %p27_p1 = scmp.eq.s32.totalorder %s26_s26, 0  ;;  %p37_p2 = scmp.eq.s32.totalorder %s1106_s21, 0 }
   0xc   : > { %p42_p3 = scmp.ne.s32.totalorder %s1098_s19, %s1094_s18  ;;  %p1437_p4 = scmp.eq.s32.totalorder %s1169_s22, 0 }
   0xd   : > { %s1185_s27 = scalar_select %p27_p1, %s1102_s20, %s29_s25  }
   0xe   : > { %p1187_p5 = por %p37_p2, %p36_p0  ;;  %p1193_p6 = por %p1437_p4, %p42_p3 }
   0xf   : > { %p155_p7 = scmp.eq.s32.totalorder %s1169_s22, 1  ;;  %p161_p8 = scmp.eq.s32.totalorder %s764_s23, 1 }
  0x10   : > { %p765_p9 = scmp.ge.s32.totalorder %s1106_s21, 1  ;;  %p168_p10 = scmp.lt.s32.totalorder %s1106_s21, 3 }
  0x11   : > { %p1200_p11 = por %p155_p7, %p36_p0  ;;  %p1204_p12 = por %p161_p8, %p42_p3 }
  0x12   : > { %p1208_p13 = pnand %p765_p9, %p168_p10  ;;  %s1444_s2 = sld [smem:[#allocation11_spill]] }
  0x13   : > { %s1442_s6 = scalar_select %p1204_p12, 1, 0 }
  0x14   : > { %p889_p1 = pneg %p1208_p13  ;;  %s1108_s11 = smov [#allocation5]  }
  0x15   : > { %s181_s12 = sshll.u32 %s1108_s11, 4  ;;  %s1109_s13 = smov 64   ;;  %s182_s12 = int_to_ptr.vmem [resolvable:$true] %s181_s12 }
  0x16   : > { %p890_p0 = pnand %p889_p1, %p1437_p4  ;;  %s1110_s14 = smov 4  }
  0x17   : > { %p1436_p2 = scmp.ge.s32.totalorder %s1106_s21, 2 }
  0x18   : > { %s179_s10 = sshll.u32 %s1444_s2, 4  ;;  %s180_s10 = int_to_ptr.hbm [resolvable:$true] %s179_s10 }
  0x19   : > { %892 = dma.hbm_to_vmem [thread:$0]  (!%p890_p0), %s180_s10, 2048, %s182_s12, [#allocation6], %s1109_s13, %s1109_s13, %s1110_s14  }
  0x1a   : > { %197 = sbr.rel (%p1436_p2) target bundleno = 68 (0x44), region = 28 }
  0x1f   : > { %200 = sbr.rel (!%p1187_p5) target bundleno = 68 (0x44), region = 32  ;;  %s201_s15 = sand.u32 (%p1187_p5), 1, %s1102_s20  }
  0x20   : > { %s769_s16 = sshll.u32 (%p1187_p5), %s1106_s21, 1  ;;  %s768_s17 = sshll.u32 (%p1187_p5), %s201_s15, 5 }
  0x21   : > { %s207_s23 = ssub.s32 (%p1187_p5), 3, %s769_s16  ;;  %s1229_s9 = scalar_lea.sflag (%p1187_p5), [#allocation3], %s201_s15 }
  0x22   : > { %p208_p3 = scmp.lt.s32.totalorder (%p1187_p5), %s207_s23, 2  ;;  %s205_s10 = scalar_lea.vmem (%p1187_p5), [#allocation2], %s768_s17 }
  0x24   : > { %s1459_s23 = smov (!%p208_p3, %s207_s23), 2 }
  0x25   : > { %s858_s25 = sshll.u32 %s1459_s23, 4 }
  0x26   : > { %s212_s26 = ssub.s32 32, %s858_s25 }
  0x27   : > { %s213_s8 = sshll.u32 %s212_s26, 4 }
  0x28   : > { %214 = vsyncadd %s1229_s9, %s213_s8  ;;  %p1232_p5 = scmp.ne.s32.totalorder %s858_s25, 0  ;;  %s860_s11 = sshll.u32 %s1106_s21, 5 }
  0x29   : > { %s218_s14 = scalar_lea.hbm %s1429_s0, %s860_s11  ;;  %s1240_s16 = sshll.u32 %s205_s10, 4  ;;  %s223_s16 = int_to_ptr.vmem [resolvable:$true] %s1240_s16 }
  0x2a   : > { %s220_s15 = sshll.u32 %s218_s14, 4  ;;  %s1435_s17 = sshll.u32 %s1459_s23, 8  ;;  %s1243_s15 = int_to_ptr.hbm [resolvable:$true] %s220_s15 }
  0x2b   : > { %s986_s26 = sshra.s32 %s1243_s15, 4  ;;  %s988_s25 = sshrl.u32 %s1435_s17, 4  ;;  %s987_s26 = int_to_ptr.hbm [resolvable:$true] %s986_s26 }
  0x2c   : > { %s993_s8 = scalar_lea.hbm %s987_s26, %s988_s25  ;;  %s997_s10 = scalar_lea.hbm %s1429_s0, 48 }
  0x2d   : > { %p994_p7 = scmp.ne.s32.totalorder %s987_s26, %s993_s8  ;;  %p998_p10 = scmp.lt.s32.totalorder %s987_s26, %s1429_s0 }
  0x2e   : > { %p999_p1 = scmp.lt.s32.totalorder %s997_s10, %s993_s8 }
  0x2f   : > { %p995_p8 = pnand %p994_p7, %p1232_p5 }
  0x30   : > { %p1000_p0 = por %p999_p1, %p998_p10 }
  0x31   : > { %p996_p9 = pneg %p995_p8 }
  0x33   : > { %p1001_p3 = pnand %p1000_p0, %p996_p9 }
  0x35   : > { %1004 = shalt.err (!%p1001_p3)
}
  0x36   : > { %s1005_s17 = sshra.s32 %s223_s16, 4  ;;  %s1111_s12 = smov [#allocation2]   ;;  %s1006_s17 = int_to_ptr.vmem [resolvable:$true] %s1005_s17 }
  0x37   : > { %s1012_s2 = scalar_lea.vmem %s1006_s17, %s988_s25  ;;  %s1016_s11 = scalar_lea.vmem %s1111_s12, 64 }
  0x38   : > { %p1013_p7 = scmp.ne.s32.totalorder %s1006_s17, %s1012_s2  ;;  %p1018_p4 = scmp.lt.s32.totalorder %s1016_s11, %s1012_s2 }
  0x3a   : > { %p1014_p8 = pnand %p1013_p7, %p1232_p5 }
  0x3c   : > { %p1015_p2 = pneg %p1014_p8 }
  0x3e   : > { %p1020_p12 = pnand %p1018_p4, %p1015_p2 }
  0x40   : > { %1023 = shalt.err (!%p1020_p12)
}
  0x41   : > { %s1112_s26 = smov 256   ;;  %s1113_s8 = smov 16  }
  0x42   : > { %s1446_s10 = sshll.u32 %s1459_s23, 8 }
  0x43   : > { %228 = dma.hbm_to_vmem [thread:$0]  (%p1232_p5), %s1243_s15, %s1446_s10, %s223_s16, %s1229_s9, %s1112_s26, %s1112_s26, %s1113_s8  }
  0x44 PF: > { %251 = sbr.rel (%p1208_p13) target bundleno = 441 (0x1b9), region = 40  ;;  %s1272_s2 = sand.u32 (!%p1208_p13), 1, %s1098_s19  }
  0x45   : > { %s778_s17 = sshll.u32 (!%p1208_p13), %s1272_s2, 5  ;;  %s254_s25 = scalar_lea.sflag (!%p1208_p13), [#allocation3], %s1272_s2 }
  0x46   : > { %s1276_s13 = scalar_lea.vmem (!%p1208_p13), [#allocation2], %s778_s17 }
  0x49   : > { %1081 = dma.done.wait (%p1193_p6), %s254_s25, 512  }
  0x4a   : > { %1083 = vsyncadd (%p1193_p6), %s254_s25, 4294966784  ;;  %p1447_p4 = scmp.eq.s32.totalorder %s1169_s22, 0 }
  0x4c   : > { %1085 = dma.done.wait (%p1447_p4), [#allocation6], 2048   ;;  %p1448_p12 = pmov %p1447_p4 }
  0x4d   : > { %s1287_s7 = sshll.u32 %s1169_s22, 1  ;;  %vm556_vm0 = vcmask 64512   ;;  %v554_v0 = vld [vmem:[%s1432_s3] sm:$0xff]  ;;  %v868_v2 = vld [vmem:[#allocation5 + $0x38] sm:$0xff]  ;;  %v867_v4 = vld [vmem:[#allocation5 + $0x30] sm:$0xff]  ;;  %v1114_v43 = vmov 128.0  }
  0x4e   : > { %1087 = vsyncadd (%p1448_p12), [#allocation6], 4294965248  ;;  %p310_p13 = scmp.lt.s32.totalorder %s1287_s7, 2  ;;  %578 = vmatpush.msra.mxu2 %v554_v0  ;;  %v876_v3 = vld [vmem:[#allocation5 + $0x78] sm:$0xff]  ;;  %465 = vmatpush.bf16.msra.mxu0 %v868_v2  ;;  %v875_v5 = vld [vmem:[#allocation5 + $0x70] sm:$0xff]  ;;  %946 = vrcp.f32 %v1114_v43  ;;  %s647_s14 = scalar_lea.sflag [#allocation4], %s1272_s2 }
  0x4f   : > { %479 = vmatpush.bf16.msra.mxu1 %v876_v3  ;;  %v866_v6 = vld [vmem:[#allocation5 + $0x28] sm:$0xff]  ;;  %v865_v9 = vld [vmem:[#allocation5 + $0x20] sm:$0xff]  ;;  %v864_v11 = vld [vmem:[#allocation5 + $0x18] sm:$0xff]  ;;  %s655_s12 = ssub.s32 (%p1200_p11), 3, %s1287_s7 }
  0x50   : > { %s311_s23 = scalar_select %p310_p13, %s1287_s7, 2  ;;  %v874_v8 = vld [vmem:[#allocation5 + $0x68] sm:$0xff]  ;;  %v873_v10 = vld [vmem:[#allocation5 + $0x60] sm:$0xff]  ;;  %v872_v12 = vld [vmem:[#allocation5 + $0x58] sm:$0xff] }
  0x51   : > { %v863_v13 = vld [vmem:[#allocation5 + $0x10] sm:$0xff]  ;;  %v862_v15 = vld [vmem:[#allocation5 + $0x8] sm:$0xff]  ;;  %v861_v17 = vld [vmem:[#allocation5] sm:$0xff]  ;;  %p656_p6 = scmp.lt.s32.totalorder (%p1200_p11), %s655_s12, 2 }
  0x52   : > { %s782_s9 = sshll.u32 %s311_s23, 3  ;;  %466 = vmatpush.bf16.msra.mxu0 %v867_v4  ;;  %v871_v14 = vld [vmem:[#allocation5 + $0x50] sm:$0xff]  ;;  %v870_v16 = vld [vmem:[#allocation5 + $0x48] sm:$0xff]  ;;  %v330_v18 = vld [vmem:[%s1276_s13] sm:$0xff] }
  0x53   : > { %s313_s15 = scalar_lea.vmem %s1430_s1, %s782_s9  ;;  %480 = vmatpush.bf16.msra.mxu1 %v875_v5  ;;  %v332_v19 = vld [vmem:[%s1276_s13 + $0x10] sm:$0xff]  ;;  %v869_v20 = vld [vmem:[#allocation5 + $0x40] sm:$0xff]  ;;  %v331_v21 = vld [vmem:[%s1276_s13 + $0x8] sm:$0xff] }
  0x54   : > { %v552_v1 = vld [vmem:[%s313_s15] sm:$0xff]  ;;  %v553_v7 = vld [vmem:[%s313_s15 + $0x8] sm:$0xff]  ;;  %v333_v22 = vld [vmem:[%s1276_s13 + $0x18] sm:$0xff]  ;;  %v334_v23 = vpack.c.bf16 %v332_v19, %v330_v18  ;;  %v947_v44 = vpop.eup %946  ;;  %s780_s15 = sshll.u32 %s1272_s2, 3 }
  0x55   : > { %847 = vmatmul.msk.f32.vlgmr.msra.gmra.mxu2 %vm556_vm0, %v552_v1  ;;  %v335_v24 = vpack.c.bf16 %v333_v22, %v331_v21  ;;  %v940_v25 = vld [vmem:[%s1433_s4 + $0x3] ss:$0 sm:$0xff]  ;;  %v941_v31 = vld [vmem:[%s1433_s4] ss:$0 sm:$0xff]  ;;  %v498_v45 = vmul.f32 128.0, %v947_v44  ;;  %vm502_vm1 = vweird.f32 %v947_v44  ;;  %s298_s29 = scalar_lea.vmem [#allocation7], %s780_s15 }
  0x56   : > { %467 = vmatpush.bf16.msra.mxu0 %v866_v6 }
  0x57   : > { %481 = vmatpush.bf16.msra.mxu1 %v874_v8  ;;  %v499_v47 = vsub.f32 1.0, %v498_v45 }
  0x59   : > { %v500_v48 = vmul.f32 %v947_v44, %v499_v47 }
  0x5a   : > { %468 = vmatpush.bf16.msra.mxu0 %v865_v9 }
  0x5b   : > { %482 = vmatpush.bf16.msra.mxu1 %v873_v10  ;;  %v501_v50 = vadd.f32 %v947_v44, %v500_v48 }
  0x5d   : > { %848 = vmatmul.msk.f32.gmra.mxu2 %vm556_vm0, %v553_v7  ;;  %v503_v51 = vsel %vm502_vm1, %v947_v44, %v501_v50 }
  0x5e   : > { %469 = vmatpush.bf16.msra.mxu0 %v864_v11 }
  0x5f   : > { %483 = vmatpush.bf16.msra.mxu1 %v872_v12 }
  0x62   : > { %470 = vmatpush.bf16.msra.mxu0 %v863_v13 }
  0x63   : > { %484 = vmatpush.bf16.msra.mxu1 %v871_v14 }
  0x66   : > { %471 = vmatpush.bf16.msra.mxu0 %v862_v15 }
  0x67   : > { %485 = vmatpush.bf16.msra.mxu1 %v870_v16 }
  0x6a   : > { %472 = vmatpush.bf16.msra.mxu0 %v861_v17 }
  0x6b   : > { %486 = vmatpush.bf16.msra.mxu1 %v869_v20 }
  0x6d   : > { %473 = vmatmul.bf16.vlgmr.msra.gmra.mxu0 %v334_v23 }
  0x6e   : > { %487 = vmatmul.bf16.vlgmr.msra.gmra.mxu1 %v335_v24 }
  0xd8   : > { %v580_v26 = vpop.f32.mrf.mxu2 }
  0xd9   : > { %v1306_v27 = vadd.f32 %v940_v25, %v580_v26 }
  0xdb   : > { %586 = vadd.xlane.f32.xlu1 %v1306_v27  ;;  %v592_v42 = vmul.f32 %v1306_v27, %v1306_v27 }
  0xe0   : > { %v583_v28 = vpop.f32.mrf.mxu2 }
  0xe1   : > { %v1309_v29 = vadd.f32 %v940_v25, %v583_v28 }
  0xe3   : > { %588 = vadd.xlane.f32.xlu1 %v1309_v29  ;;  %v593_v30 = vmul.f32 %v1309_v29, %v1309_v29 }
  0xea   : > { %v474_v32 = vpop.f32.mrf.mxu0 }
  0xeb   : > { %596 = vadd.xlane.f32.xlu1 %v593_v30  ;;  %v475_v33 = vadd.f32 %v941_v31, %v474_v32  ;;  %v488_v34 = vpop.f32.mrf.mxu1 }
  0xed   : > { %v1317_v35 = vadd.f32 %v488_v34, %v475_v33 }
  0xef   : > { %493 = vadd.xlane.f32.xlu0 %v1317_v35  ;;  %v506_v36 = vmul.f32 %v1317_v35, %v1317_v35 }
  0xf1   : > { %508 = vadd.xlane.f32.xlu2 %v506_v36 }
  0xf2   : > { %v476_v37 = vpop.f32.mrf.mxu0 }
  0xf3   : > { %v477_v38 = vadd.f32 %v941_v31, %v476_v37  ;;  %v490_v39 = vpop.f32.mrf.mxu1 }
  0xf5   : > { %v1322_v40 = vadd.f32 %v490_v39, %v477_v38 }
  0xf7   : > { %495 = vadd.xlane.f32.xlu0 %v1322_v40  ;;  %v507_v41 = vmul.f32 %v1322_v40, %v1322_v40 }
  0xf9   : > { %510 = vadd.xlane.f32.xlu2 %v507_v41 }
  0xff   : > { %594 = vadd.xlane.f32.xlu0 %v592_v42 }
 0x14e   : > { %v587_v46 = vpop.xlane.xlu1 %586 }
 0x14f   : > { %v1337_v11 = vmul.f32 %v587_v46, %v503_v51 }
 0x151   : > { %v600_v15 = vmul.f32 %v1337_v11, %v1337_v11 }
 0x156   : > { %v589_v49 = vpop.xlane.xlu1 %588 }
 0x157   : > { %v1329_v52 = vmul.f32 %v589_v49, %v503_v51  ;;  %v942_v49 = vld [vmem:[%s1433_s4 + $0x4] ss:$0 sm:$0xff] }
 0x159   : > { %v601_v53 = vmul.f32 %v1329_v52, %v1329_v52  ;;  %v607_v44 = vsub.f32 %v1309_v29, %v1329_v52  ;;  %v944_v29 = vld [vmem:[%s1433_s4 + $0x1] ss:$0 sm:$0xff] }
 0x15e   : > { %v597_v54 = vpop.xlane.xlu1 %596 }
 0x15f   : > { %v599_v55 = vmul.f32 %v597_v54, %v503_v51 }
 0x161   : > { %v603_v56 = vsub.f32 %v599_v55, %v601_v53 }
 0x162   : > { %v494_v58 = vpop.xlane.xlu0 %493 }
 0x163   : > { %v605_v57 = vmax.f32 %v603_v56, 0.0  ;;  %v1333_v60 = vmul.f32 %v503_v51, %v494_v58 }
 0x164   : > { %v509_v61 = vpop.xlane.xlu2 %508 }
 0x165   : > { %v609_v59 = vadd.f32 1e-12, %v605_v57  ;;  %v514_v62 = vmul.f32 %v1333_v60, %v1333_v60  ;;  %v512_v63 = vmul.f32 %v509_v61, %v503_v51  ;;  %v606_v57 = vsub.f32 %v1306_v27, %v1337_v11 }
 0x167   : > { %948 = vrsqrt.f32 %v609_v59  ;;  %v516_v0 = vsub.f32 %v512_v63, %v514_v62  ;;  %vm626_vm2 = vweird.f32 %v609_v59 }
 0x169   : > { %v518_v1 = vmax.f32 %v516_v0, 0.0 }
 0x16a   : > { %v496_v2 = vpop.xlane.xlu0 %495 }
 0x16b   : > { %v522_v3 = vadd.f32 1e-12, %v518_v1  ;;  %v505_v4 = vmul.f32 %v503_v51, %v496_v2 }
 0x16c   : > { %v511_v5 = vpop.xlane.xlu2 %510 }
 0x16d   : > { %v949_v6 = vpop.eup %948  ;;  %950 = vrsqrt.f32 %v522_v3  ;;  %v515_v7 = vmul.f32 %v505_v4, %v505_v4  ;;  %v513_v8 = vmul.f32 %v511_v5, %v503_v51  ;;  %vm530_vm7 = vweird.f32 %v522_v3 }
 0x16e   : > { %v621_v9 = vmul.f32 %v949_v6, %v609_v59  ;;  %vm627_vm3 = vweird.f32 %v949_v6  ;;  %v521_v47 = vsub.f32 %v1322_v40, %v505_v4  ;;  %v945_v59 = vld [vmem:[%s1433_s4 + $0x2] ss:$0 sm:$0xff] }
 0x16f   : > { %v517_v10 = vsub.f32 %v513_v8, %v515_v7  ;;  %vm1341_vm4 = vmor %vm626_vm2, %vm627_vm3 }
 0x170   : > { %v622_v17 = vmul.f32 %v949_v6, %v621_v9 }
 0x171   : > { %v519_v12 = vmax.f32 %v517_v10, 0.0 }
 0x172   : > { %v595_v13 = vpop.xlane.xlu0 %594  ;;  %v623_v23 = vmul.f32 0.5, %v622_v17 }
 0x173   : > { %v951_v14 = vpop.eup %950  ;;  %v598_v16 = vmul.f32 %v595_v13, %v503_v51  ;;  %v523_v19 = vadd.f32 1e-12, %v519_v12  ;;  %v520_v51 = vsub.f32 %v1317_v35, %v1333_v60  ;;  %v943_v35 = vld [vmem:[%s1433_s4 + $0x5] ss:$0 sm:$0xff] }
 0x174   : > { %v525_v18 = vmul.f32 %v951_v14, %v522_v3  ;;  %v624_v28 = vsub.f32 1.5, %v623_v23  ;;  %vm531_vm5 = vweird.f32 %v951_v14 }
 0x175   : > { %v602_v20 = vsub.f32 %v598_v16, %v600_v15  ;;  %952 = vrsqrt.f32 %v523_v19  ;;  %vm532_vm8 = vmor %vm530_vm7, %vm531_vm5  ;;  %vm540_vm9 = vweird.f32 %v523_v19 }
 0x176   : > { %v526_v21 = vmul.f32 %v951_v14, %v525_v18  ;;  %v625_v33 = vmul.f32 %v949_v6, %v624_v28 }
 0x177   : > { %v604_v22 = vmax.f32 %v602_v20, 0.0 }
 0x178   : > { %v527_v25 = vmul.f32 0.5, %v526_v21  ;;  %v629_v42 = vsel %vm1341_vm4, %v949_v6, %v625_v33 }
 0x179   : > { %v608_v24 = vadd.f32 1e-12, %v604_v22  ;;  %v631_v50 = vmul.f32 %v629_v42, %v607_v44 }
 0x17a   : > { %v528_v31 = vsub.f32 1.5, %v527_v25 }
 0x17b   : > { %954 = vrsqrt.f32 %v608_v24  ;;  %v953_v26 = vpop.eup %952  ;;  %vm616_vm12 = vweird.f32 %v608_v24  ;;  %v634_v58 = vmul.f32 %v942_v49, %v631_v50 }
 0x17c   : > { %v535_v30 = vmul.f32 %v953_v26, %v523_v19  ;;  %v529_v38 = vmul.f32 %v951_v14, %v528_v31  ;;  %vm541_vm6 = vweird.f32 %v953_v26 }
 0x17d   : > { %vm542_vm10 = vmor %vm540_vm9, %vm541_vm6  ;;  %v637_v0 = vadd.f32 %v943_v35, %v634_v58 }
 0x17e   : > { %v536_v32 = vmul.f32 %v953_v26, %v535_v30  ;;  %v533_v46 = vsel %vm532_vm8, %v951_v14, %v529_v38 }
 0x17f   : > { %v544_v55 = vmul.f32 %v533_v46, %v520_v51 }
 0x180   : > { %v537_v37 = vmul.f32 0.5, %v536_v32 }
 0x181   : > { %v955_v34 = vpop.eup %954  ;;  %v547_v61 = vmul.f32 %v944_v29, %v544_v55 }
 0x182   : > { %v611_v39 = vmul.f32 %v955_v34, %v608_v24  ;;  %v538_v41 = vsub.f32 1.5, %v537_v37  ;;  %vm617_vm11 = vweird.f32 %v955_v34 }
 0x183   : > { %vm618_vm13 = vmor %vm616_vm12, %vm617_vm11  ;;  %v550_v2 = vadd.f32 %v945_v59, %v547_v61 }
 0x184   : > { %v612_v43 = vmul.f32 %v955_v34, %v611_v39  ;;  %v539_v45 = vmul.f32 %v953_v26, %v538_v41 }
 0x186   : > { %v613_v48 = vmul.f32 0.5, %v612_v43  ;;  %v543_v53 = vsel %vm542_vm10, %v953_v26, %v539_v45 }
 0x187   : > { %v545_v52 = vmul.f32 %v543_v53, %v521_v47 }
 0x188   : > { %v614_v54 = vsub.f32 1.5, %v613_v48 }
 0x189   : > { %v548_v40 = vmul.f32 %v944_v29, %v545_v52 }
 0x18a   : > { %v615_v56 = vmul.f32 %v955_v34, %v614_v54 }
 0x18b   : > { %v551_v62 = vadd.f32 %v945_v59, %v548_v40 }
 0x18c   : > { %v619_v60 = vsel %vm618_vm13, %v955_v34, %v615_v56 }
 0x18d   : > { %v630_v63 = vmul.f32 %v619_v60, %v606_v57  ;;  %v639_v3 = vadd.f32 %v637_v0, %v551_v62 }
 0x18f   : > { %v633_v1 = vmul.f32 %v942_v49, %v630_v63  ;;  %v641_v5 = vmul.f32 0.5, %v639_v3 }
 0x191   : > { %v636_v27 = vadd.f32 %v943_v35, %v633_v1 }
 0x193   : > { %v638_v4 = vadd.f32 %v636_v27, %v550_v2 }
 0x195   : > { %v640_v6 = vmul.f32 0.5, %v638_v4  ;;  %653 = sbr.rel (!%p1200_p11) target bundleno = 441 (0x1b9), region = 52 }
 0x197   : > { %v881_v7 = vpack.c.bf16 %v641_v5, %v640_v6 }
 0x199   : > { %882 = vst [vmem:[%s298_s29] sm:$0xff] %v881_v7  }
 0x19a   : > { %s1461_s12 = smov (!%p656_p6, %s655_s12), 2 }
 0x19b   : > { %s851_s11 = sshll.u32 %s1461_s12, 2 }
 0x19c   : > { %s659_s26 = ssub.s32 8, %s851_s11 }
 0x19d   : > { %s660_s8 = sshll.u32 %s659_s26, 4 }
 0x19e   : > { %661 = vsyncadd %s647_s14, %s660_s8  ;;  %p1376_p2 = scmp.ne.s32.totalorder %s851_s11, 0  ;;  %s877_s30 = sshll.u32 %s1169_s22, 3 }
 0x19f   : > { %s664_s25 = scalar_lea.hbm %s1434_s5, %s877_s30  ;;  %s666_s13 = sshll.u32 %s298_s29, 4  ;;  %s1384_s13 = int_to_ptr.vmem [resolvable:$true] %s666_s13 }
 0x1a0   : > { %s668_s23 = sshll.u32 %s664_s25, 4  ;;  %s855_s9 = sshll.u32 %s1461_s12, 6  ;;  %s1386_s23 = int_to_ptr.hbm [resolvable:$true] %s668_s23 }
 0x1a1   : > { %s1025_s28 = sshra.s32 %s1384_s13, 4  ;;  %s1027_s16 = sshrl.u32 %s855_s9, 4  ;;  %s1026_s28 = int_to_ptr.vmem [resolvable:$true] %s1025_s28 }
 0x1a2   : > { %s1032_s15 = scalar_lea.vmem %s1026_s28, %s1027_s16  ;;  %s1115_s22 = smov [#allocation7]  }
 0x1a3   : > { %p1033_p11 = scmp.ne.s32.totalorder %s1026_s28, %s1032_s15  ;;  %s1036_s11 = scalar_lea.vmem %s1115_s22, 16 }
 0x1a4   : > { %p1038_p10 = scmp.lt.s32.totalorder %s1036_s11, %s1032_s15 }
 0x1a5   : > { %p1034_p5 = pnand %p1033_p11, %p1376_p2 }
 0x1a7   : > { %p1035_p9 = pneg %p1034_p5 }
 0x1a9   : > { %p1040_p1 = pnand %p1038_p10, %p1035_p9 }
 0x1ab   : > { %1043 = shalt.err (!%p1040_p1)
}
 0x1ac   : > { %s1044_s29 = sshra.s32 %s1386_s23, 4  ;;  %s1055_s17 = scalar_lea.hbm %s1434_s5, 12  ;;  %s1045_s29 = int_to_ptr.hbm [resolvable:$true] %s1044_s29 }
 0x1ad   : > { %s1051_s26 = scalar_lea.hbm %s1045_s29, %s1027_s16  ;;  %p1056_p8 = scmp.lt.s32.totalorder %s1045_s29, %s1434_s5 }
 0x1ae   : > { %p1052_p0 = scmp.ne.s32.totalorder %s1045_s29, %s1051_s26  ;;  %p1057_p4 = scmp.lt.s32.totalorder %s1055_s17, %s1051_s26 }
 0x1b0   : > { %p1053_p3 = pnand %p1052_p0, %p1376_p2  ;;  %p1058_p12 = por %p1057_p4, %p1056_p8 }
 0x1b2   : > { %p1054_p7 = pneg %p1053_p3 }
 0x1b4   : > { %p1059_p13 = pnand %p1058_p12, %p1054_p7 }
 0x1b6   : > { %1062 = shalt.err (!%p1059_p13)
}
 0x1b7   : > { %s1116_s28 = smov 64   ;;  %s1117_s16 = smov 4  }
 0x1b8   : > { %674 = dma.vmem_to_hbm [thread:$0]  (%p1376_p2), %s1384_s13, %s855_s9, %s1386_s23, %s647_s14, %s1116_s28, %s1116_s28, %s1117_s16  }
 0x1b9 PF: > { %s683_s15 = sand.u32 1, %s1094_s18   ;;  %p1452_p6 = scmp.ne.s32.totalorder %s1442_s6, 0 }
 0x1ba   : > { %p1453_p11 = scmp.ge.s32.totalorder %s1106_s21, 2  ;;  %s684_s22 = scalar_lea.sflag [#allocation4], %s683_s15 }
 0x1bc   : > { %p894_p5 = pnand %p1453_p11, %p1452_p6 }
 0x1be   : > { %p895_p9 = pneg %p894_p5 }
 0x1c0   : > { %1089 = dma.done.wait (%p895_p9), %s684_s22, 128  }
 0x1c1   : > { %1091 = vsyncadd (%p895_p9), %s684_s22, 4294967168  ;;  %p19_p10 = scmp.ge.s32.totalorder %s1173_s24, 4   ;;  %s1454_s18 = smov %s1098_s19 }
 0x1c2   : > { %s1455_s19 = smov %s1102_s20  ;;  %s1456_s20 = smov %s1185_s27 }
 0x1c3   : > { %s1457_s21 = smov %s1173_s24  ;;  %21 = sbr.rel (!%p19_p10) target bundleno = 8 (0x8), region = 92 }
 0x1c8   :  { %690 = vsyncpa [#allocation3], 1 }
 0x1c9   :  { %692 = vsyncpa [#allocation3 + $0x1], 1 }
 0x1ca   :  { %693 = vsyncpa [#allocation6], 1 }
 0x1cb   :  { %694 = vsyncpa [#allocation4], 1 }
 0x1cc   :  { %696 = vsyncpa [#allocation4 + $0x1], 1 }

</bundles_post_ra>
